<compile_context>
chip_gen: v6e
topology: v6e:2x2x1
jax: 0.10.0
libtpu: 0.0.40
codegen_flags: <defaults>
</compile_context>

<pallas_src>
import functools

import jax
import jax.numpy as jnp
import numpy as np
from jax import lax
from jax.experimental import pallas as pl
from jax.experimental.pallas import tpu as pltpu


_INV_SQRT2 = 0.7071067811865476


def _erf(x):
    # Abramowitz & Stegun 7.1.26 (max abs error ~1.5e-7).
    a1, a2, a3, a4, a5 = (0.254829592, -0.284496736, 1.421413741,
                          -1.453152027, 1.061405429)
    p = 0.3275911
    ax = jnp.abs(x)
    # The divide rides the EUP slot (approximate reciprocal) -> VPU stays free.
    t = pl.reciprocal(1.0 + p * ax, approx=True)
    poly = ((((a5 * t + a4) * t + a3) * t + a2) * t + a1) * t
    y = 1.0 - poly * jnp.exp(-ax * ax)
    return jnp.where(x >= 0, y, -y)


def _gelu(x):
    # Matches torch.nn.GELU(approximate='none') (exact erf form).
    return 0.5 * x * (1.0 + _erf(x * _INV_SQRT2))


# --------------------------- fused Pallas kernel ---------------------------

def _convmixer_kernel(xp_ref, wpe_ref, pe_ref, dw_ref, vec_ref, pw_ref,
                      pool_ref, wlin_ref, blin_ref, o_ref, *, seq_len):
    """One grid step = one batch row-tile; runs stem + all blocks + head."""
    n_rows = xp_ref.shape[0]                       # Bt * Lp
    depth, n_taps, _ = dw_ref.shape
    pad_l = (n_taps - 1) // 2

    # ---- stem: BN0-folded patch conv (bf16 MXU / f32 acc) + GELU + BN1 ----
    pe = pe_ref[...]                               # (3, dim) f32
    h = jnp.dot(xp_ref[...].astype(jnp.bfloat16), wpe_ref[...],
                preferred_element_type=jnp.float32) + pe[0:1, :]
    h = _gelu(h) * pe[1:2, :] + pe[2:3, :]

    # Per-tap validity masks for 'same' padding.  pltpu.roll is circular, so
    # anything dragged across a sequence / batch / tile edge is zeroed here.
    l_idx = lax.broadcasted_iota(jnp.int32, (n_rows, 1), 0) % seq_len
    masks = [jnp.logical_and(l_idx + (k - pad_l) >= 0,
                             l_idx + (k - pad_l) < seq_len)
             for k in range(n_taps)]

    def block_body(d, x):
        dw = dw_ref[d]                             # (K, dim)  f32
        vec = vec_ref[d]                           # (6, dim)  f32
        # Depthwise Conv1d(dim, dim, K, groups=dim, padding='same'):
        # K-1 sublane rolls (XLU) + mask/FMA (VPU); the MXU stays free.
        conv = x * dw[pad_l:pad_l + 1, :]          # centre tap, always valid
        for k in range(n_taps):
            off = k - pad_l
            if off == 0:
                continue
            tap = pltpu.roll(x, shift=(-off) % n_rows, axis=0)
            conv = conv + jnp.where(masks[k], tap, 0.0) * dw[k:k + 1, :]
        conv = conv + vec[0:1, :]                  # depthwise bias
        hmid = _gelu(conv) * vec[1:2, :] + vec[2:3, :] + x   # GELU + BN + resid

        # Pointwise Conv1d(dim, dim, 1): (Nt, dim) x (dim, dim) bf16 matmul.
        y = jnp.dot(hmid.astype(jnp.bfloat16), pw_ref[d],
                    preferred_element_type=jnp.float32) + vec[3:4, :]
        return _gelu(y) * vec[4:5, :] + vec[5:6, :]          # GELU + BN

    h = lax.fori_loop(0, depth, block_body, h, unroll=True)

    # ---- head: avg-pool + Linear + LogSoftmax (per batch row-tile) ----
    pooled = jnp.dot(pool_ref[...], h.astype(jnp.bfloat16),
                     preferred_element_type=jnp.float32)     # (Bt, dim)
    logits = jnp.dot(pooled.astype(jnp.bfloat16), wlin_ref[...],
                     preferred_element_type=jnp.float32) + blin_ref[...]
    z = logits - jnp.max(logits, axis=-1, keepdims=True)
    o_ref[0] = z - jnp.log(jnp.sum(jnp.exp(z), axis=-1, keepdims=True))


# ----------------------------- host-side glue ------------------------------

def _bn_fold(gamma, beta, mean, var, eps=1e-5):
    scale = gamma / jnp.sqrt(var + eps)
    shift = beta - mean * scale
    return scale, shift


def _make_local_pool_matrix(batch_tile, seq_len):
    p = np.zeros((batch_tile, batch_tile * seq_len), np.float32)
    for b in range(batch_tile):
        p[b, b * seq_len:(b + 1) * seq_len] = 1.0 / seq_len
    return jnp.asarray(p, dtype=jnp.bfloat16)


def convmixer_forward(x, params, *, patch_size, kernel_size, batch_tile=1):
    B, cin, L = x.shape
    P, K = patch_size, kernel_size
    Lp = (L - P) // P + 1
    dim = params["patch_w"].shape[0]
    n_classes = params["lin_w"].shape[0]
    depth = len(params["blocks"])
    assert depth >= 1, "fused kernel expects depth >= 1"
    eps = 1e-5

    # The 'parallel' row-tile axis must keep whole batch elements per tile
    # (halo-free) and a sublane-aligned row count; otherwise use one tile.
    if B % batch_tile != 0 or (batch_tile * Lp) % 8 != 0:
        batch_tile = B
    Bt = batch_tile
    n_tiles = B // Bt
    Nt, N = Bt * Lp, B * Lp

    # Patch extraction: (B, Cin, L) -> (B*Lp, P*Cin); flat index = p*Cin + c.
    xt = jnp.transpose(x[:, :, :Lp * P], (0, 2, 1))
    xp = xt.reshape(B, Lp, P, cin).reshape(N, P * cin)

    # Fold BatchNorm1d(input, affine=False) into the patch-conv weights.
    s0 = 1.0 / jnp.sqrt(params["bn0_var"] + eps)
    sh0 = -params["bn0_mean"] * s0
    w_t = jnp.transpose(params["patch_w"], (2, 1, 0))              # (P, Cin, D)
    w_pe = (w_t * s0[None, :, None]).reshape(P * cin, dim).astype(jnp.bfloat16)
    b_pe = params["patch_b"] + jnp.einsum("pcd,c->d", w_t, sh0)
    s1, sh1 = _bn_fold(params["bn1_gamma"], params["bn1_beta"],
                       params["bn1_mean"], params["bn1_var"])
    pe_vec = jnp.stack([b_pe, s1, sh1], axis=0)                    # (3, D) f32

    # Stack per-block weights along a leading depth axis.
    dw_w = jnp.stack([jnp.transpose(b_["dw_w"][:, 0, :], (1, 0))
                      for b_ in params["blocks"]])                 # (depth,K,D)
    pw_w = jnp.stack([jnp.transpose(b_["pw_w"][:, :, 0], (1, 0))
                      for b_ in params["blocks"]]).astype(jnp.bfloat16)
    blk_vec = []
    for b_ in params["blocks"]:
        sa, sha = _bn_fold(b_["bna_gamma"], b_["bna_beta"],
                           b_["bna_mean"], b_["bna_var"])
        sb, shb = _bn_fold(b_["bnb_gamma"], b_["bnb_beta"],
                           b_["bnb_mean"], b_["bnb_var"])
        blk_vec.append(jnp.stack([b_["dw_b"], sa, sha, b_["pw_b"], sb, shb], 0))
    blk_vec = jnp.stack(blk_vec)                                   # (depth,6,D)

    pool_local = _make_local_pool_matrix(Bt, Lp)                   # (Bt, Nt)
    w_lin = jnp.transpose(params["lin_w"], (1, 0)).astype(jnp.bfloat16)
    b_lin = params["lin_b"][None, :]                               # (1, C) f32

    kernel = functools.partial(_convmixer_kernel, seq_len=Lp)
    out = pl.pallas_call(
        kernel,
        out_shape=jax.ShapeDtypeStruct((n_tiles, Bt, n_classes), jnp.float32),
        grid=(n_tiles,),
        in_specs=[
            pl.BlockSpec((Nt, P * cin), lambda t: (t, 0)),          # xp tile
            pl.BlockSpec((P * cin, dim), lambda t: (0, 0)),         # w_pe
            pl.BlockSpec((3, dim), lambda t: (0, 0)),               # pe_vec
            pl.BlockSpec((depth, K, dim), lambda t: (0, 0, 0)),     # dw_w
            pl.BlockSpec((depth, 6, dim), lambda t: (0, 0, 0)),     # blk_vec
            pl.BlockSpec((depth, dim, dim), lambda t: (0, 0, 0)),   # pw_w
            pl.BlockSpec((Bt, Nt), lambda t: (0, 0)),               # pool_local
            pl.BlockSpec((dim, n_classes), lambda t: (0, 0)),       # w_lin
            pl.BlockSpec((1, n_classes), lambda t: (0, 0)),         # b_lin
        ],
        out_specs=pl.BlockSpec((1, Bt, n_classes), lambda t: (t, 0, 0)),
        compiler_params=pltpu.CompilerParams(
            dimension_semantics=("parallel",),
            vmem_limit_bytes=32 * 1024 * 1024),
    )(xp, w_pe, pe_vec, dw_w, blk_vec, pw_w, pool_local, w_lin, b_lin)
    # TODO(synk): for production shapes (dim a multiple of 128, large depth)
    # re-introduce a depth grid axis and single-buffer (pl.Buffered(1)) the
    # constant-index weight inputs once stacked weights exceed the VMEM budget.
    return out.reshape(B, n_classes)


# ----------------------- pure-JAX reference (for check) --------------------

def _bn_apply(x, gamma, beta, mean, var, eps=1e-5):
    s = gamma / jnp.sqrt(var + eps)
    return x * s[None, :, None] + (beta - mean * s)[None, :, None]


def _reference_forward(x, params, *, patch_size, kernel_size):
    eps = 1e-5
    B, cin, L = x.shape
    Lp = (L - patch_size) // patch_size + 1
    gelu = lambda t: jax.nn.gelu(t, approximate=False)

    h = (x - params["bn0_mean"][None, :, None]) / \
        jnp.sqrt(params["bn0_var"] + eps)[None, :, None]
    hw = h[:, :, :Lp * patch_size].reshape(B, cin, Lp, patch_size)
    h = jnp.einsum("bclp,dcp->bdl", hw, params["patch_w"]) \
        + params["patch_b"][None, :, None]
    h = _bn_apply(gelu(h), params["bn1_gamma"], params["bn1_beta"],
                  params["bn1_mean"], params["bn1_var"])

    pad_l = (kernel_size - 1) // 2
    pad_r = kernel_size - 1 - pad_l
    for blk in params["blocks"]:
        resid = h
        hp = jnp.pad(h, ((0, 0), (0, 0), (pad_l, pad_r)))
        dwc = jnp.zeros_like(h)
        for k in range(kernel_size):
            dwc = dwc + hp[:, :, k:k + Lp] * blk["dw_w"][None, :, 0, k, None]
        dwc = dwc + blk["dw_b"][None, :, None]
        t = _bn_apply(gelu(dwc), blk["bna_gamma"], blk["bna_beta"],
                      blk["bna_mean"], blk["bna_var"]) + resid
        pwc = jnp.einsum("bcl,dc->bdl", t, blk["pw_w"][:, :, 0]) \
            + blk["pw_b"][None, :, None]
        h = _bn_apply(gelu(pwc), blk["bnb_gamma"], blk["bnb_beta"],
                      blk["bnb_mean"], blk["bnb_var"])

    pooled = jnp.mean(h, axis=-1)
    logits = pooled @ params["lin_w"].T + params["lin_b"]
    return jax.nn.log_softmax(logits, axis=-1)


# ------------------------------- params init -------------------------------

def init_params(key, cin, dim, depth, kernel_size, patch_size, n_classes):
    keys = iter(jax.random.split(key, 16 + depth * 16))
    nrm = lambda shape, s=0.1: s * jax.random.normal(next(keys), shape, jnp.float32)
    uni = lambda shape: jax.random.uniform(next(keys), shape, dtype=jnp.float32)

    def bn_stats(n):
        return dict(gamma=1.0 + nrm((n,)), beta=nrm((n,)),
                    mean=nrm((n,)), var=0.5 + uni((n,)))

    params = {
        "bn0_mean": nrm((cin,)),                 # BatchNorm1d(input, affine=False)
        "bn0_var": 0.5 + uni((cin,)),
        "patch_w": nrm((dim, cin, patch_size)),  # Conv1d(cin, dim, P, stride=P)
        "patch_b": nrm((dim,)),
    }
    bn1 = bn_stats(dim)
    params.update(bn1_gamma=bn1["gamma"], bn1_beta=bn1["beta"],
                  bn1_mean=bn1["mean"], bn1_var=bn1["var"])

    blocks = []
    for _ in range(depth):
        bna, bnb = bn_stats(dim), bn_stats(dim)
        blocks.append(dict(
            dw_w=nrm((dim, 1, kernel_size)), dw_b=nrm((dim,)),   # depthwise conv
            bna_gamma=bna["gamma"], bna_beta=bna["beta"],
            bna_mean=bna["mean"], bna_var=bna["var"],
            pw_w=nrm((dim, dim, 1)), pw_b=nrm((dim,)),           # 1x1 conv
            bnb_gamma=bnb["gamma"], bnb_beta=bnb["beta"],
            bnb_mean=bnb["mean"], bnb_var=bnb["var"],
        ))
    params["blocks"] = blocks
    params["lin_w"] = nrm((n_classes, dim))
    params["lin_b"] = nrm((n_classes,))
    return params


if __name__ == "__main__":
    # Shapes consistent with the module: input_shape=(4, 112), dim=32,
    # depth=2, kernel_size=9, patch_size=7, n_classes=2.
    B, Cin, L = 2, 4, 112
    dim, depth, K, P, n_classes = 32, 2, 9, 7, 2

    key = jax.random.PRNGKey(0)
    k_x, k_p = jax.random.split(key)
    x = jax.random.normal(k_x, (B, Cin, L), dtype=jnp.float32)
    params = init_params(k_p, Cin, dim, depth, K, P, n_classes)

    fwd = jax.jit(functools.partial(convmixer_forward, patch_size=P,
                                    kernel_size=K, batch_tile=1))
    out = jax.block_until_ready(fwd(x, params))

    assert out.shape == (B, n_classes), out.shape
    assert bool(jnp.all(jnp.isfinite(out)))
    # log-softmax rows sum to ~1 in probability space
    assert bool(jnp.allclose(jnp.sum(jnp.exp(out), axis=-1), 1.0, atol=1e-4))
    # compare against a pure-JAX reference of the PyTorch forward; bf16 MXU
    # operands (f32 accumulation) + EUP approx reciprocal in GELU give a
    # ~1e-3-level deviation from the f32 reference, hence the 1e-2 tolerance.
    ref = _reference_forward(x, params, patch_size=P, kernel_size=K)
    assert bool(jnp.allclose(out, ref, atol=1e-2, rtol=1e-2)), (out, ref)
    print("KERNEL_OK")
</pallas_src>

<mosaic_0001>
module attributes {stable_mosaic.version = 11 : i64} {
  func.func @_convmixer_kernel(%arg0: i32, %arg1: memref<16x28xf32, #tpu.memory_space<vmem>>, %arg2: memref<28x32xbf16, #tpu.memory_space<vmem>>, %arg3: memref<3x32xf32, #tpu.memory_space<vmem>>, %arg4: memref<2x9x32xf32, #tpu.memory_space<vmem>>, %arg5: memref<2x6x32xf32, #tpu.memory_space<vmem>>, %arg6: memref<2x32x32xbf16, #tpu.memory_space<vmem>>, %arg7: memref<1x16xbf16, #tpu.memory_space<vmem>>, %arg8: memref<32x2xbf16, #tpu.memory_space<vmem>>, %arg9: memref<1x2xf32, #tpu.memory_space<vmem>>, %arg10: memref<1x1x2xf32, #tpu.memory_space<vmem>>) attributes {dimension_semantics = [#tpu.dimension_semantics<parallel>], iteration_bounds = array<i64: 2>, scalar_prefetch = 0 : i64, scratch_operands = 0 : i64, tpu.core_type = #tpu.core_type<tc>, window_params = [{transform_indices = @transform_0, window_bounds = array<i64: 16, 28>}, {pipeline_mode = #tpu.pipeline_mode<synchronous>, transform_indices = @transform_1, window_bounds = array<i64: 28, 32>}, {pipeline_mode = #tpu.pipeline_mode<synchronous>, transform_indices = @transform_2, window_bounds = array<i64: 3, 32>}, {pipeline_mode = #tpu.pipeline_mode<synchronous>, transform_indices = @transform_3, window_bounds = array<i64: 2, 9, 32>}, {pipeline_mode = #tpu.pipeline_mode<synchronous>, transform_indices = @transform_4, window_bounds = array<i64: 2, 6, 32>}, {pipeline_mode = #tpu.pipeline_mode<synchronous>, transform_indices = @transform_5, window_bounds = array<i64: 2, 32, 32>}, {pipeline_mode = #tpu.pipeline_mode<synchronous>, transform_indices = @transform_6, window_bounds = array<i64: 1, 16>}, {pipeline_mode = #tpu.pipeline_mode<synchronous>, transform_indices = @transform_7, window_bounds = array<i64: 32, 2>}, {pipeline_mode = #tpu.pipeline_mode<synchronous>, transform_indices = @transform_8, window_bounds = array<i64: 1, 2>}, {transform_indices = @transform_9, window_bounds = array<i64: 1, 1, 2>}]} {
    %c0 = arith.constant 0 : index
    %c0_0 = arith.constant 0 : index
    %0 = vector.load %arg3[%c0, %c0_0] : memref<3x32xf32, #tpu.memory_space<vmem>>, vector<3x32xf32>
    %c0_1 = arith.constant 0 : index
    %c0_2 = arith.constant 0 : index
    %1 = vector.load %arg1[%c0_1, %c0_2] : memref<16x28xf32, #tpu.memory_space<vmem>>, vector<16x28xf32>
    %2 = arith.truncf %1 : vector<16x28xf32> to vector<16x28xbf16>
    %c0_3 = arith.constant 0 : index
    %c0_4 = arith.constant 0 : index
    %3 = vector.load %arg2[%c0_3, %c0_4] : memref<28x32xbf16, #tpu.memory_space<vmem>>, vector<28x32xbf16>
    %cst = arith.constant dense<0.000000e+00> : vector<16x32xf32>
    %4 = tpu.matmul %2, %3, %cst {dimension_numbers = #tpu.dot_dimension_numbers<[1], [0], [0], [1], [0, 0, 1, 1], [], []>} : vector<16x28xbf16>, vector<28x32xbf16>, vector<16x32xf32> -> vector<16x32xf32>
    %5 = vector.extract_strided_slice %0 {offsets = [0, 0], sizes = [1, 32], strides = [1, 1]} : vector<3x32xf32> to vector<1x32xf32>
    %6 = vector.broadcast %5 : vector<1x32xf32> to vector<16x32xf32>
    %7 = arith.addf %4, %6 : vector<16x32xf32>
    %cst_5 = arith.constant 5.000000e-01 : f32
    %8 = vector.broadcast %cst_5 : f32 to vector<16x32xf32>
    %9 = arith.mulf %8, %7 : vector<16x32xf32>
    %cst_6 = arith.constant 0.707106769 : f32
    %10 = vector.broadcast %cst_6 : f32 to vector<16x32xf32>
    %11 = arith.mulf %7, %10 : vector<16x32xf32>
    %12 = math.absf %11 : vector<16x32xf32>
    %cst_7 = arith.constant 0.327591091 : f32
    %13 = vector.broadcast %cst_7 : f32 to vector<16x32xf32>
    %14 = arith.mulf %13, %12 : vector<16x32xf32>
    %cst_8 = arith.constant 1.000000e+00 : f32
    %15 = vector.broadcast %cst_8 : f32 to vector<16x32xf32>
    %16 = arith.addf %15, %14 : vector<16x32xf32>
    %17 = tpu.reciprocal %16 {approx = true} : vector<16x32xf32> -> vector<16x32xf32>
    %cst_9 = arith.constant 1.06140542 : f32
    %18 = vector.broadcast %cst_9 : f32 to vector<16x32xf32>
    %19 = arith.mulf %18, %17 : vector<16x32xf32>
    %cst_10 = arith.constant -1.45315206 : f32
    %20 = vector.broadcast %cst_10 : f32 to vector<16x32xf32>
    %21 = arith.addf %19, %20 : vector<16x32xf32>
    %22 = arith.mulf %21, %17 : vector<16x32xf32>
    %cst_11 = arith.constant 1.42141378 : f32
    %23 = vector.broadcast %cst_11 : f32 to vector<16x32xf32>
    %24 = arith.addf %22, %23 : vector<16x32xf32>
    %25 = arith.mulf %24, %17 : vector<16x32xf32>
    %cst_12 = arith.constant -0.284496725 : f32
    %26 = vector.broadcast %cst_12 : f32 to vector<16x32xf32>
    %27 = arith.addf %25, %26 : vector<16x32xf32>
    %28 = arith.mulf %27, %17 : vector<16x32xf32>
    %cst_13 = arith.constant 0.254829586 : f32
    %29 = vector.broadcast %cst_13 : f32 to vector<16x32xf32>
    %30 = arith.addf %28, %29 : vector<16x32xf32>
    %31 = arith.mulf %30, %17 : vector<16x32xf32>
    %cst_14 = arith.constant 0.000000e+00 : f32
    %32 = vector.broadcast %cst_14 : f32 to vector<16x32xf32>
    %33 = arith.subf %32, %12 : vector<16x32xf32>
    %34 = arith.mulf %33, %12 : vector<16x32xf32>
    %35 = math.exp %34 : vector<16x32xf32>
    %36 = arith.mulf %31, %35 : vector<16x32xf32>
    %cst_15 = arith.constant 1.000000e+00 : f32
    %37 = vector.broadcast %cst_15 : f32 to vector<16x32xf32>
    %38 = arith.subf %37, %36 : vector<16x32xf32>
    %cst_16 = arith.constant 0.000000e+00 : f32
    %39 = vector.broadcast %cst_16 : f32 to vector<16x32xf32>
    %40 = arith.cmpf oge, %11, %39 : vector<16x32xf32>
    %cst_17 = arith.constant 0.000000e+00 : f32
    %41 = vector.broadcast %cst_17 : f32 to vector<16x32xf32>
    %42 = arith.subf %41, %38 : vector<16x32xf32>
    %43 = arith.select %40, %38, %42 : vector<16x32xi1>, vector<16x32xf32>
    %cst_18 = arith.constant 1.000000e+00 : f32
    %44 = vector.broadcast %cst_18 : f32 to vector<16x32xf32>
    %45 = arith.addf %44, %43 : vector<16x32xf32>
    %46 = arith.mulf %9, %45 : vector<16x32xf32>
    %47 = vector.extract_strided_slice %0 {offsets = [1, 0], sizes = [1, 32], strides = [1, 1]} : vector<3x32xf32> to vector<1x32xf32>
    %48 = vector.broadcast %47 : vector<1x32xf32> to vector<16x32xf32>
    %49 = arith.mulf %46, %48 : vector<16x32xf32>
    %50 = vector.extract_strided_slice %0 {offsets = [2, 0], sizes = [1, 32], strides = [1, 1]} : vector<3x32xf32> to vector<1x32xf32>
    %51 = vector.broadcast %50 : vector<1x32xf32> to vector<16x32xf32>
    %52 = arith.addf %49, %51 : vector<16x32xf32>
    %53 = tpu.iota {dimensions = array<i32: 0>} : vector<16x1xi32>
    %c16_i32 = arith.constant 16 : i32
    %c0_i32 = arith.constant 0 : i32
    %54 = arith.cmpi eq, %c16_i32, %c0_i32 : i32
    %c1_i32 = arith.constant 1 : i32
    %55 = arith.select %54, %c1_i32, %c16_i32 : i32
    %56 = vector.broadcast %55 : i32 to vector<16x1xi32>
    %57 = arith.remsi %53, %56 : vector<16x1xi32>
    %c0_i32_19 = arith.constant 0 : i32
    %58 = vector.broadcast %c0_i32_19 : i32 to vector<16x1xi32>
    %59 = arith.cmpi ne, %57, %58 : vector<16x1xi32>
    %c0_i32_20 = arith.constant 0 : i32
    %60 = vector.broadcast %c0_i32_20 : i32 to vector<16x1xi32>
    %61 = arith.cmpi slt, %57, %60 : vector<16x1xi32>
    %c0_i32_21 = arith.constant 0 : i32
    %62 = arith.cmpi slt, %55, %c0_i32_21 : i32
    %63 = vector.broadcast %62 : i1 to vector<16x1xi1>
    %64 = vector.broadcast %63 : vector<16x1xi1> to vector<16x1xi1>
    %65 = arith.xori %61, %64 : vector<16x1xi1>
    %66 = arith.andi %65, %59 : vector<16x1xi1>
    %67 = vector.broadcast %55 : i32 to vector<16x1xi32>
    %68 = arith.addi %57, %67 : vector<16x1xi32>
    %69 = arith.select %66, %68, %57 : vector<16x1xi1>, vector<16x1xi32>
    %c-4_i32 = arith.constant -4 : i32
    %70 = vector.broadcast %c-4_i32 : i32 to vector<16x1xi32>
    %71 = arith.addi %69, %70 : vector<16x1xi32>
    %c0_i32_22 = arith.constant 0 : i32
    %72 = vector.broadcast %c0_i32_22 : i32 to vector<16x1xi32>
    %73 = arith.cmpi sge, %71, %72 : vector<16x1xi32>
    %c-4_i32_23 = arith.constant -4 : i32
    %74 = vector.broadcast %c-4_i32_23 : i32 to vector<16x1xi32>
    %75 = arith.addi %69, %74 : vector<16x1xi32>
    %c16_i32_24 = arith.constant 16 : i32
    %76 = vector.broadcast %c16_i32_24 : i32 to vector<16x1xi32>
    %77 = arith.cmpi slt, %75, %76 : vector<16x1xi32>
    %78 = arith.andi %73, %77 : vector<16x1xi1>
    %c-3_i32 = arith.constant -3 : i32
    %79 = vector.broadcast %c-3_i32 : i32 to vector<16x1xi32>
    %80 = arith.addi %69, %79 : vector<16x1xi32>
    %c0_i32_25 = arith.constant 0 : i32
    %81 = vector.broadcast %c0_i32_25 : i32 to vector<16x1xi32>
    %82 = arith.cmpi sge, %80, %81 : vector<16x1xi32>
    %c-3_i32_26 = arith.constant -3 : i32
    %83 = vector.broadcast %c-3_i32_26 : i32 to vector<16x1xi32>
    %84 = arith.addi %69, %83 : vector<16x1xi32>
    %c16_i32_27 = arith.constant 16 : i32
    %85 = vector.broadcast %c16_i32_27 : i32 to vector<16x1xi32>
    %86 = arith.cmpi slt, %84, %85 : vector<16x1xi32>
    %87 = arith.andi %82, %86 : vector<16x1xi1>
    %c-2_i32 = arith.constant -2 : i32
    %88 = vector.broadcast %c-2_i32 : i32 to vector<16x1xi32>
    %89 = arith.addi %69, %88 : vector<16x1xi32>
    %c0_i32_28 = arith.constant 0 : i32
    %90 = vector.broadcast %c0_i32_28 : i32 to vector<16x1xi32>
    %91 = arith.cmpi sge, %89, %90 : vector<16x1xi32>
    %c-2_i32_29 = arith.constant -2 : i32
    %92 = vector.broadcast %c-2_i32_29 : i32 to vector<16x1xi32>
    %93 = arith.addi %69, %92 : vector<16x1xi32>
    %c16_i32_30 = arith.constant 16 : i32
    %94 = vector.broadcast %c16_i32_30 : i32 to vector<16x1xi32>
    %95 = arith.cmpi slt, %93, %94 : vector<16x1xi32>
    %96 = arith.andi %91, %95 : vector<16x1xi1>
    %c-1_i32 = arith.constant -1 : i32
    %97 = vector.broadcast %c-1_i32 : i32 to vector<16x1xi32>
    %98 = arith.addi %69, %97 : vector<16x1xi32>
    %c0_i32_31 = arith.constant 0 : i32
    %99 = vector.broadcast %c0_i32_31 : i32 to vector<16x1xi32>
    %100 = arith.cmpi sge, %98, %99 : vector<16x1xi32>
    %c-1_i32_32 = arith.constant -1 : i32
    %101 = vector.broadcast %c-1_i32_32 : i32 to vector<16x1xi32>
    %102 = arith.addi %69, %101 : vector<16x1xi32>
    %c16_i32_33 = arith.constant 16 : i32
    %103 = vector.broadcast %c16_i32_33 : i32 to vector<16x1xi32>
    %104 = arith.cmpi slt, %102, %103 : vector<16x1xi32>
    %105 = arith.andi %100, %104 : vector<16x1xi1>
    %c1_i32_34 = arith.constant 1 : i32
    %106 = vector.broadcast %c1_i32_34 : i32 to vector<16x1xi32>
    %107 = arith.addi %69, %106 : vector<16x1xi32>
    %c0_i32_35 = arith.constant 0 : i32
    %108 = vector.broadcast %c0_i32_35 : i32 to vector<16x1xi32>
    %109 = arith.cmpi sge, %107, %108 : vector<16x1xi32>
    %c1_i32_36 = arith.constant 1 : i32
    %110 = vector.broadcast %c1_i32_36 : i32 to vector<16x1xi32>
    %111 = arith.addi %69, %110 : vector<16x1xi32>
    %c16_i32_37 = arith.constant 16 : i32
    %112 = vector.broadcast %c16_i32_37 : i32 to vector<16x1xi32>
    %113 = arith.cmpi slt, %111, %112 : vector<16x1xi32>
    %114 = arith.andi %109, %113 : vector<16x1xi1>
    %c2_i32 = arith.constant 2 : i32
    %115 = vector.broadcast %c2_i32 : i32 to vector<16x1xi32>
    %116 = arith.addi %69, %115 : vector<16x1xi32>
    %c0_i32_38 = arith.constant 0 : i32
    %117 = vector.broadcast %c0_i32_38 : i32 to vector<16x1xi32>
    %118 = arith.cmpi sge, %116, %117 : vector<16x1xi32>
    %c2_i32_39 = arith.constant 2 : i32
    %119 = vector.broadcast %c2_i32_39 : i32 to vector<16x1xi32>
    %120 = arith.addi %69, %119 : vector<16x1xi32>
    %c16_i32_40 = arith.constant 16 : i32
    %121 = vector.broadcast %c16_i32_40 : i32 to vector<16x1xi32>
    %122 = arith.cmpi slt, %120, %121 : vector<16x1xi32>
    %123 = arith.andi %118, %122 : vector<16x1xi1>
    %c3_i32 = arith.constant 3 : i32
    %124 = vector.broadcast %c3_i32 : i32 to vector<16x1xi32>
    %125 = arith.addi %69, %124 : vector<16x1xi32>
    %c0_i32_41 = arith.constant 0 : i32
    %126 = vector.broadcast %c0_i32_41 : i32 to vector<16x1xi32>
    %127 = arith.cmpi sge, %125, %126 : vector<16x1xi32>
    %c3_i32_42 = arith.constant 3 : i32
    %128 = vector.broadcast %c3_i32_42 : i32 to vector<16x1xi32>
    %129 = arith.addi %69, %128 : vector<16x1xi32>
    %c16_i32_43 = arith.constant 16 : i32
    %130 = vector.broadcast %c16_i32_43 : i32 to vector<16x1xi32>
    %131 = arith.cmpi slt, %129, %130 : vector<16x1xi32>
    %132 = arith.andi %127, %131 : vector<16x1xi1>
    %c4_i32 = arith.constant 4 : i32
    %133 = vector.broadcast %c4_i32 : i32 to vector<16x1xi32>
    %134 = arith.addi %69, %133 : vector<16x1xi32>
    %c0_i32_44 = arith.constant 0 : i32
    %135 = vector.broadcast %c0_i32_44 : i32 to vector<16x1xi32>
    %136 = arith.cmpi sge, %134, %135 : vector<16x1xi32>
    %c4_i32_45 = arith.constant 4 : i32
    %137 = vector.broadcast %c4_i32_45 : i32 to vector<16x1xi32>
    %138 = arith.addi %69, %137 : vector<16x1xi32>
    %c16_i32_46 = arith.constant 16 : i32
    %139 = vector.broadcast %c16_i32_46 : i32 to vector<16x1xi32>
    %140 = arith.cmpi slt, %138, %139 : vector<16x1xi32>
    %141 = arith.andi %136, %140 : vector<16x1xi1>
    %c0_i32_47 = arith.constant 0 : i32
    %142 = arith.index_cast %c0_i32_47 : i32 to index
    %c0_48 = arith.constant 0 : index
    %c0_49 = arith.constant 0 : index
    %143 = vector.load %arg4[%142, %c0_48, %c0_49] : memref<2x9x32xf32, #tpu.memory_space<vmem>>, vector<1x9x32xf32>
    %144 = vector.shape_cast %143 : vector<1x9x32xf32> to vector<9x32xf32>
    %145 = arith.index_cast %c0_i32_47 : i32 to index
    %c0_50 = arith.constant 0 : index
    %c0_51 = arith.constant 0 : index
    %146 = vector.load %arg5[%145, %c0_50, %c0_51] : memref<2x6x32xf32, #tpu.memory_space<vmem>>, vector<1x6x32xf32>
    %147 = vector.shape_cast %146 : vector<1x6x32xf32> to vector<6x32xf32>
    %148 = vector.extract_strided_slice %144 {offsets = [4, 0], sizes = [1, 32], strides = [1, 1]} : vector<9x32xf32> to vector<1x32xf32>
    %149 = vector.broadcast %148 : vector<1x32xf32> to vector<16x32xf32>
    %150 = arith.mulf %52, %149 : vector<16x32xf32>
    %c4_i32_52 = arith.constant 4 : i32
    %151 = tpu.dynamic_rotate %52 by %c4_i32_52 dim 0 : vector<16x32xf32>, i32 -> vector<16x32xf32>
    %cst_53 = arith.constant 0.000000e+00 : f32
    %152 = vector.shape_cast %78 : vector<16x1xi1> to vector<16x1xi1>
    %153 = vector.broadcast %152 : vector<16x1xi1> to vector<16x32xi1>
    %154 = vector.broadcast %cst_53 : f32 to vector<16x32xf32>
    %155 = arith.select %153, %151, %154 : vector<16x32xi1>, vector<16x32xf32>
    %156 = vector.extract_strided_slice %144 {offsets = [0, 0], sizes = [1, 32], strides = [1, 1]} : vector<9x32xf32> to vector<1x32xf32>
    %157 = vector.broadcast %156 : vector<1x32xf32> to vector<16x32xf32>
    %158 = arith.mulf %155, %157 : vector<16x32xf32>
    %159 = arith.addf %150, %158 : vector<16x32xf32>
    %c3_i32_54 = arith.constant 3 : i32
    %160 = tpu.dynamic_rotate %52 by %c3_i32_54 dim 0 : vector<16x32xf32>, i32 -> vector<16x32xf32>
    %cst_55 = arith.constant 0.000000e+00 : f32
    %161 = vector.shape_cast %87 : vector<16x1xi1> to vector<16x1xi1>
    %162 = vector.broadcast %161 : vector<16x1xi1> to vector<16x32xi1>
    %163 = vector.broadcast %cst_55 : f32 to vector<16x32xf32>
    %164 = arith.select %162, %160, %163 : vector<16x32xi1>, vector<16x32xf32>
    %165 = vector.extract_strided_slice %144 {offsets = [1, 0], sizes = [1, 32], strides = [1, 1]} : vector<9x32xf32> to vector<1x32xf32>
    %166 = vector.broadcast %165 : vector<1x32xf32> to vector<16x32xf32>
    %167 = arith.mulf %164, %166 : vector<16x32xf32>
    %168 = arith.addf %159, %167 : vector<16x32xf32>
    %c2_i32_56 = arith.constant 2 : i32
    %169 = tpu.dynamic_rotate %52 by %c2_i32_56 dim 0 : vector<16x32xf32>, i32 -> vector<16x32xf32>
    %cst_57 = arith.constant 0.000000e+00 : f32
    %170 = vector.shape_cast %96 : vector<16x1xi1> to vector<16x1xi1>
    %171 = vector.broadcast %170 : vector<16x1xi1> to vector<16x32xi1>
    %172 = vector.broadcast %cst_57 : f32 to vector<16x32xf32>
    %173 = arith.select %171, %169, %172 : vector<16x32xi1>, vector<16x32xf32>
    %174 = vector.extract_strided_slice %144 {offsets = [2, 0], sizes = [1, 32], strides = [1, 1]} : vector<9x32xf32> to vector<1x32xf32>
    %175 = vector.broadcast %174 : vector<1x32xf32> to vector<16x32xf32>
    %176 = arith.mulf %173, %175 : vector<16x32xf32>
    %177 = arith.addf %168, %176 : vector<16x32xf32>
    %c1_i32_58 = arith.constant 1 : i32
    %178 = tpu.dynamic_rotate %52 by %c1_i32_58 dim 0 : vector<16x32xf32>, i32 -> vector<16x32xf32>
    %cst_59 = arith.constant 0.000000e+00 : f32
    %179 = vector.shape_cast %105 : vector<16x1xi1> to vector<16x1xi1>
    %180 = vector.broadcast %179 : vector<16x1xi1> to vector<16x32xi1>
    %181 = vector.broadcast %cst_59 : f32 to vector<16x32xf32>
    %182 = arith.select %180, %178, %181 : vector<16x32xi1>, vector<16x32xf32>
    %183 = vector.extract_strided_slice %144 {offsets = [3, 0], sizes = [1, 32], strides = [1, 1]} : vector<9x32xf32> to vector<1x32xf32>
    %184 = vector.broadcast %183 : vector<1x32xf32> to vector<16x32xf32>
    %185 = arith.mulf %182, %184 : vector<16x32xf32>
    %186 = arith.addf %177, %185 : vector<16x32xf32>
    %c15_i32 = arith.constant 15 : i32
    %187 = tpu.dynamic_rotate %52 by %c15_i32 dim 0 : vector<16x32xf32>, i32 -> vector<16x32xf32>
    %cst_60 = arith.constant 0.000000e+00 : f32
    %188 = vector.shape_cast %114 : vector<16x1xi1> to vector<16x1xi1>
    %189 = vector.broadcast %188 : vector<16x1xi1> to vector<16x32xi1>
    %190 = vector.broadcast %cst_60 : f32 to vector<16x32xf32>
    %191 = arith.select %189, %187, %190 : vector<16x32xi1>, vector<16x32xf32>
    %192 = vector.extract_strided_slice %144 {offsets = [5, 0], sizes = [1, 32], strides = [1, 1]} : vector<9x32xf32> to vector<1x32xf32>
    %193 = vector.broadcast %192 : vector<1x32xf32> to vector<16x32xf32>
    %194 = arith.mulf %191, %193 : vector<16x32xf32>
    %195 = arith.addf %186, %194 : vector<16x32xf32>
    %c14_i32 = arith.constant 14 : i32
    %196 = tpu.dynamic_rotate %52 by %c14_i32 dim 0 : vector<16x32xf32>, i32 -> vector<16x32xf32>
    %cst_61 = arith.constant 0.000000e+00 : f32
    %197 = vector.shape_cast %123 : vector<16x1xi1> to vector<16x1xi1>
    %198 = vector.broadcast %197 : vector<16x1xi1> to vector<16x32xi1>
    %199 = vector.broadcast %cst_61 : f32 to vector<16x32xf32>
    %200 = arith.select %198, %196, %199 : vector<16x32xi1>, vector<16x32xf32>
    %201 = vector.extract_strided_slice %144 {offsets = [6, 0], sizes = [1, 32], strides = [1, 1]} : vector<9x32xf32> to vector<1x32xf32>
    %202 = vector.broadcast %201 : vector<1x32xf32> to vector<16x32xf32>
    %203 = arith.mulf %200, %202 : vector<16x32xf32>
    %204 = arith.addf %195, %203 : vector<16x32xf32>
    %c13_i32 = arith.constant 13 : i32
    %205 = tpu.dynamic_rotate %52 by %c13_i32 dim 0 : vector<16x32xf32>, i32 -> vector<16x32xf32>
    %cst_62 = arith.constant 0.000000e+00 : f32
    %206 = vector.shape_cast %132 : vector<16x1xi1> to vector<16x1xi1>
    %207 = vector.broadcast %206 : vector<16x1xi1> to vector<16x32xi1>
    %208 = vector.broadcast %cst_62 : f32 to vector<16x32xf32>
    %209 = arith.select %207, %205, %208 : vector<16x32xi1>, vector<16x32xf32>
    %210 = vector.extract_strided_slice %144 {offsets = [7, 0], sizes = [1, 32], strides = [1, 1]} : vector<9x32xf32> to vector<1x32xf32>
    %211 = vector.broadcast %210 : vector<1x32xf32> to vector<16x32xf32>
    %212 = arith.mulf %209, %211 : vector<16x32xf32>
    %213 = arith.addf %204, %212 : vector<16x32xf32>
    %c12_i32 = arith.constant 12 : i32
    %214 = tpu.dynamic_rotate %52 by %c12_i32 dim 0 : vector<16x32xf32>, i32 -> vector<16x32xf32>
    %cst_63 = arith.constant 0.000000e+00 : f32
    %215 = vector.shape_cast %141 : vector<16x1xi1> to vector<16x1xi1>
    %216 = vector.broadcast %215 : vector<16x1xi1> to vector<16x32xi1>
    %217 = vector.broadcast %cst_63 : f32 to vector<16x32xf32>
    %218 = arith.select %216, %214, %217 : vector<16x32xi1>, vector<16x32xf32>
    %219 = vector.extract_strided_slice %144 {offsets = [8, 0], sizes = [1, 32], strides = [1, 1]} : vector<9x32xf32> to vector<1x32xf32>
    %220 = vector.broadcast %219 : vector<1x32xf32> to vector<16x32xf32>
    %221 = arith.mulf %218, %220 : vector<16x32xf32>
    %222 = arith.addf %213, %221 : vector<16x32xf32>
    %223 = vector.extract_strided_slice %147 {offsets = [0, 0], sizes = [1, 32], strides = [1, 1]} : vector<6x32xf32> to vector<1x32xf32>
    %224 = vector.broadcast %223 : vector<1x32xf32> to vector<16x32xf32>
    %225 = arith.addf %222, %224 : vector<16x32xf32>
    %cst_64 = arith.constant 5.000000e-01 : f32
    %226 = vector.broadcast %cst_64 : f32 to vector<16x32xf32>
    %227 = arith.mulf %226, %225 : vector<16x32xf32>
    %cst_65 = arith.constant 0.707106769 : f32
    %228 = vector.broadcast %cst_65 : f32 to vector<16x32xf32>
    %229 = arith.mulf %225, %228 : vector<16x32xf32>
    %230 = math.absf %229 : vector<16x32xf32>
    %cst_66 = arith.constant 0.327591091 : f32
    %231 = vector.broadcast %cst_66 : f32 to vector<16x32xf32>
    %232 = arith.mulf %231, %230 : vector<16x32xf32>
    %cst_67 = arith.constant 1.000000e+00 : f32
    %233 = vector.broadcast %cst_67 : f32 to vector<16x32xf32>
    %234 = arith.addf %233, %232 : vector<16x32xf32>
    %235 = tpu.reciprocal %234 {approx = true} : vector<16x32xf32> -> vector<16x32xf32>
    %cst_68 = arith.constant 1.06140542 : f32
    %236 = vector.broadcast %cst_68 : f32 to vector<16x32xf32>
    %237 = arith.mulf %236, %235 : vector<16x32xf32>
    %cst_69 = arith.constant -1.45315206 : f32
    %238 = vector.broadcast %cst_69 : f32 to vector<16x32xf32>
    %239 = arith.addf %237, %238 : vector<16x32xf32>
    %240 = arith.mulf %239, %235 : vector<16x32xf32>
    %cst_70 = arith.constant 1.42141378 : f32
    %241 = vector.broadcast %cst_70 : f32 to vector<16x32xf32>
    %242 = arith.addf %240, %241 : vector<16x32xf32>
    %243 = arith.mulf %242, %235 : vector<16x32xf32>
    %cst_71 = arith.constant -0.284496725 : f32
    %244 = vector.broadcast %cst_71 : f32 to vector<16x32xf32>
    %245 = arith.addf %243, %244 : vector<16x32xf32>
    %246 = arith.mulf %245, %235 : vector<16x32xf32>
    %cst_72 = arith.constant 0.254829586 : f32
    %247 = vector.broadcast %cst_72 : f32 to vector<16x32xf32>
    %248 = arith.addf %246, %247 : vector<16x32xf32>
    %249 = arith.mulf %248, %235 : vector<16x32xf32>
    %cst_73 = arith.constant 0.000000e+00 : f32
    %250 = vector.broadcast %cst_73 : f32 to vector<16x32xf32>
    %251 = arith.subf %250, %230 : vector<16x32xf32>
    %252 = arith.mulf %251, %230 : vector<16x32xf32>
    %253 = math.exp %252 : vector<16x32xf32>
    %254 = arith.mulf %249, %253 : vector<16x32xf32>
    %cst_74 = arith.constant 1.000000e+00 : f32
    %255 = vector.broadcast %cst_74 : f32 to vector<16x32xf32>
    %256 = arith.subf %255, %254 : vector<16x32xf32>
    %cst_75 = arith.constant 0.000000e+00 : f32
    %257 = vector.broadcast %cst_75 : f32 to vector<16x32xf32>
    %258 = arith.cmpf oge, %229, %257 : vector<16x32xf32>
    %cst_76 = arith.constant 0.000000e+00 : f32
    %259 = vector.broadcast %cst_76 : f32 to vector<16x32xf32>
    %260 = arith.subf %259, %256 : vector<16x32xf32>
    %261 = arith.select %258, %256, %260 : vector<16x32xi1>, vector<16x32xf32>
    %cst_77 = arith.constant 1.000000e+00 : f32
    %262 = vector.broadcast %cst_77 : f32 to vector<16x32xf32>
    %263 = arith.addf %262, %261 : vector<16x32xf32>
    %264 = arith.mulf %227, %263 : vector<16x32xf32>
    %265 = vector.extract_strided_slice %147 {offsets = [1, 0], sizes = [1, 32], strides = [1, 1]} : vector<6x32xf32> to vector<1x32xf32>
    %266 = vector.broadcast %265 : vector<1x32xf32> to vector<16x32xf32>
    %267 = arith.mulf %264, %266 : vector<16x32xf32>
    %268 = vector.extract_strided_slice %147 {offsets = [2, 0], sizes = [1, 32], strides = [1, 1]} : vector<6x32xf32> to vector<1x32xf32>
    %269 = vector.broadcast %268 : vector<1x32xf32> to vector<16x32xf32>
    %270 = arith.addf %267, %269 : vector<16x32xf32>
    %271 = arith.addf %270, %52 : vector<16x32xf32>
    %272 = arith.truncf %271 : vector<16x32xf32> to vector<16x32xbf16>
    %273 = arith.index_cast %c0_i32_47 : i32 to index
    %c0_78 = arith.constant 0 : index
    %c0_79 = arith.constant 0 : index
    %274 = vector.load %arg6[%273, %c0_78, %c0_79] : memref<2x32x32xbf16, #tpu.memory_space<vmem>>, vector<1x32x32xbf16>
    %275 = vector.shape_cast %274 : vector<1x32x32xbf16> to vector<32x32xbf16>
    %cst_80 = arith.constant dense<0.000000e+00> : vector<16x32xf32>
    %276 = tpu.matmul %272, %275, %cst_80 {dimension_numbers = #tpu.dot_dimension_numbers<[1], [0], [0], [1], [0, 0, 1, 1], [], []>} : vector<16x32xbf16>, vector<32x32xbf16>, vector<16x32xf32> -> vector<16x32xf32>
    %277 = vector.extract_strided_slice %147 {offsets = [3, 0], sizes = [1, 32], strides = [1, 1]} : vector<6x32xf32> to vector<1x32xf32>
    %278 = vector.broadcast %277 : vector<1x32xf32> to vector<16x32xf32>
    %279 = arith.addf %276, %278 : vector<16x32xf32>
    %cst_81 = arith.constant 5.000000e-01 : f32
    %280 = vector.broadcast %cst_81 : f32 to vector<16x32xf32>
    %281 = arith.mulf %280, %279 : vector<16x32xf32>
    %cst_82 = arith.constant 0.707106769 : f32
    %282 = vector.broadcast %cst_82 : f32 to vector<16x32xf32>
    %283 = arith.mulf %279, %282 : vector<16x32xf32>
    %284 = math.absf %283 : vector<16x32xf32>
    %cst_83 = arith.constant 0.327591091 : f32
    %285 = vector.broadcast %cst_83 : f32 to vector<16x32xf32>
    %286 = arith.mulf %285, %284 : vector<16x32xf32>
    %cst_84 = arith.constant 1.000000e+00 : f32
    %287 = vector.broadcast %cst_84 : f32 to vector<16x32xf32>
    %288 = arith.addf %287, %286 : vector<16x32xf32>
    %289 = tpu.reciprocal %288 {approx = true} : vector<16x32xf32> -> vector<16x32xf32>
    %cst_85 = arith.constant 1.06140542 : f32
    %290 = vector.broadcast %cst_85 : f32 to vector<16x32xf32>
    %291 = arith.mulf %290, %289 : vector<16x32xf32>
    %cst_86 = arith.constant -1.45315206 : f32
    %292 = vector.broadcast %cst_86 : f32 to vector<16x32xf32>
    %293 = arith.addf %291, %292 : vector<16x32xf32>
    %294 = arith.mulf %293, %289 : vector<16x32xf32>
    %cst_87 = arith.constant 1.42141378 : f32
    %295 = vector.broadcast %cst_87 : f32 to vector<16x32xf32>
    %296 = arith.addf %294, %295 : vector<16x32xf32>
    %297 = arith.mulf %296, %289 : vector<16x32xf32>
    %cst_88 = arith.constant -0.284496725 : f32
    %298 = vector.broadcast %cst_88 : f32 to vector<16x32xf32>
    %299 = arith.addf %297, %298 : vector<16x32xf32>
    %300 = arith.mulf %299, %289 : vector<16x32xf32>
    %cst_89 = arith.constant 0.254829586 : f32
    %301 = vector.broadcast %cst_89 : f32 to vector<16x32xf32>
    %302 = arith.addf %300, %301 : vector<16x32xf32>
    %303 = arith.mulf %302, %289 : vector<16x32xf32>
    %cst_90 = arith.constant 0.000000e+00 : f32
    %304 = vector.broadcast %cst_90 : f32 to vector<16x32xf32>
    %305 = arith.subf %304, %284 : vector<16x32xf32>
    %306 = arith.mulf %305, %284 : vector<16x32xf32>
    %307 = math.exp %306 : vector<16x32xf32>
    %308 = arith.mulf %303, %307 : vector<16x32xf32>
    %cst_91 = arith.constant 1.000000e+00 : f32
    %309 = vector.broadcast %cst_91 : f32 to vector<16x32xf32>
    %310 = arith.subf %309, %308 : vector<16x32xf32>
    %cst_92 = arith.constant 0.000000e+00 : f32
    %311 = vector.broadcast %cst_92 : f32 to vector<16x32xf32>
    %312 = arith.cmpf oge, %283, %311 : vector<16x32xf32>
    %cst_93 = arith.constant 0.000000e+00 : f32
    %313 = vector.broadcast %cst_93 : f32 to vector<16x32xf32>
    %314 = arith.subf %313, %310 : vector<16x32xf32>
    %315 = arith.select %312, %310, %314 : vector<16x32xi1>, vector<16x32xf32>
    %cst_94 = arith.constant 1.000000e+00 : f32
    %316 = vector.broadcast %cst_94 : f32 to vector<16x32xf32>
    %317 = arith.addf %316, %315 : vector<16x32xf32>
    %318 = arith.mulf %281, %317 : vector<16x32xf32>
    %319 = vector.extract_strided_slice %147 {offsets = [4, 0], sizes = [1, 32], strides = [1, 1]} : vector<6x32xf32> to vector<1x32xf32>
    %320 = vector.broadcast %319 : vector<1x32xf32> to vector<16x32xf32>
    %321 = arith.mulf %318, %320 : vector<16x32xf32>
    %322 = vector.extract_strided_slice %147 {offsets = [5, 0], sizes = [1, 32], strides = [1, 1]} : vector<6x32xf32> to vector<1x32xf32>
    %323 = vector.broadcast %322 : vector<1x32xf32> to vector<16x32xf32>
    %324 = arith.addf %321, %323 : vector<16x32xf32>
    %c1_i32_95 = arith.constant 1 : i32
    %325 = arith.index_cast %c1_i32_95 : i32 to index
    %c0_96 = arith.constant 0 : index
    %c0_97 = arith.constant 0 : index
    %326 = vector.load %arg4[%325, %c0_96, %c0_97] : memref<2x9x32xf32, #tpu.memory_space<vmem>>, vector<1x9x32xf32>
    %327 = vector.shape_cast %326 : vector<1x9x32xf32> to vector<9x32xf32>
    %328 = arith.index_cast %c1_i32_95 : i32 to index
    %c0_98 = arith.constant 0 : index
    %c0_99 = arith.constant 0 : index
    %329 = vector.load %arg5[%328, %c0_98, %c0_99] : memref<2x6x32xf32, #tpu.memory_space<vmem>>, vector<1x6x32xf32>
    %330 = vector.shape_cast %329 : vector<1x6x32xf32> to vector<6x32xf32>
    %331 = vector.extract_strided_slice %327 {offsets = [4, 0], sizes = [1, 32], strides = [1, 1]} : vector<9x32xf32> to vector<1x32xf32>
    %332 = vector.broadcast %331 : vector<1x32xf32> to vector<16x32xf32>
    %333 = arith.mulf %324, %332 : vector<16x32xf32>
    %c4_i32_100 = arith.constant 4 : i32
    %334 = tpu.dynamic_rotate %324 by %c4_i32_100 dim 0 : vector<16x32xf32>, i32 -> vector<16x32xf32>
    %cst_101 = arith.constant 0.000000e+00 : f32
    %335 = vector.shape_cast %78 : vector<16x1xi1> to vector<16x1xi1>
    %336 = vector.broadcast %335 : vector<16x1xi1> to vector<16x32xi1>
    %337 = vector.broadcast %cst_101 : f32 to vector<16x32xf32>
    %338 = arith.select %336, %334, %337 : vector<16x32xi1>, vector<16x32xf32>
    %339 = vector.extract_strided_slice %327 {offsets = [0, 0], sizes = [1, 32], strides = [1, 1]} : vector<9x32xf32> to vector<1x32xf32>
    %340 = vector.broadcast %339 : vector<1x32xf32> to vector<16x32xf32>
    %341 = arith.mulf %338, %340 : vector<16x32xf32>
    %342 = arith.addf %333, %341 : vector<16x32xf32>
    %c3_i32_102 = arith.constant 3 : i32
    %343 = tpu.dynamic_rotate %324 by %c3_i32_102 dim 0 : vector<16x32xf32>, i32 -> vector<16x32xf32>
    %cst_103 = arith.constant 0.000000e+00 : f32
    %344 = vector.shape_cast %87 : vector<16x1xi1> to vector<16x1xi1>
    %345 = vector.broadcast %344 : vector<16x1xi1> to vector<16x32xi1>
    %346 = vector.broadcast %cst_103 : f32 to vector<16x32xf32>
    %347 = arith.select %345, %343, %346 : vector<16x32xi1>, vector<16x32xf32>
    %348 = vector.extract_strided_slice %327 {offsets = [1, 0], sizes = [1, 32], strides = [1, 1]} : vector<9x32xf32> to vector<1x32xf32>
    %349 = vector.broadcast %348 : vector<1x32xf32> to vector<16x32xf32>
    %350 = arith.mulf %347, %349 : vector<16x32xf32>
    %351 = arith.addf %342, %350 : vector<16x32xf32>
    %c2_i32_104 = arith.constant 2 : i32
    %352 = tpu.dynamic_rotate %324 by %c2_i32_104 dim 0 : vector<16x32xf32>, i32 -> vector<16x32xf32>
    %cst_105 = arith.constant 0.000000e+00 : f32
    %353 = vector.shape_cast %96 : vector<16x1xi1> to vector<16x1xi1>
    %354 = vector.broadcast %353 : vector<16x1xi1> to vector<16x32xi1>
    %355 = vector.broadcast %cst_105 : f32 to vector<16x32xf32>
    %356 = arith.select %354, %352, %355 : vector<16x32xi1>, vector<16x32xf32>
    %357 = vector.extract_strided_slice %327 {offsets = [2, 0], sizes = [1, 32], strides = [1, 1]} : vector<9x32xf32> to vector<1x32xf32>
    %358 = vector.broadcast %357 : vector<1x32xf32> to vector<16x32xf32>
    %359 = arith.mulf %356, %358 : vector<16x32xf32>
    %360 = arith.addf %351, %359 : vector<16x32xf32>
    %c1_i32_106 = arith.constant 1 : i32
    %361 = tpu.dynamic_rotate %324 by %c1_i32_106 dim 0 : vector<16x32xf32>, i32 -> vector<16x32xf32>
    %cst_107 = arith.constant 0.000000e+00 : f32
    %362 = vector.shape_cast %105 : vector<16x1xi1> to vector<16x1xi1>
    %363 = vector.broadcast %362 : vector<16x1xi1> to vector<16x32xi1>
    %364 = vector.broadcast %cst_107 : f32 to vector<16x32xf32>
    %365 = arith.select %363, %361, %364 : vector<16x32xi1>, vector<16x32xf32>
    %366 = vector.extract_strided_slice %327 {offsets = [3, 0], sizes = [1, 32], strides = [1, 1]} : vector<9x32xf32> to vector<1x32xf32>
    %367 = vector.broadcast %366 : vector<1x32xf32> to vector<16x32xf32>
    %368 = arith.mulf %365, %367 : vector<16x32xf32>
    %369 = arith.addf %360, %368 : vector<16x32xf32>
    %c15_i32_108 = arith.constant 15 : i32
    %370 = tpu.dynamic_rotate %324 by %c15_i32_108 dim 0 : vector<16x32xf32>, i32 -> vector<16x32xf32>
    %cst_109 = arith.constant 0.000000e+00 : f32
    %371 = vector.shape_cast %114 : vector<16x1xi1> to vector<16x1xi1>
    %372 = vector.broadcast %371 : vector<16x1xi1> to vector<16x32xi1>
    %373 = vector.broadcast %cst_109 : f32 to vector<16x32xf32>
    %374 = arith.select %372, %370, %373 : vector<16x32xi1>, vector<16x32xf32>
    %375 = vector.extract_strided_slice %327 {offsets = [5, 0], sizes = [1, 32], strides = [1, 1]} : vector<9x32xf32> to vector<1x32xf32>
    %376 = vector.broadcast %375 : vector<1x32xf32> to vector<16x32xf32>
    %377 = arith.mulf %374, %376 : vector<16x32xf32>
    %378 = arith.addf %369, %377 : vector<16x32xf32>
    %c14_i32_110 = arith.constant 14 : i32
    %379 = tpu.dynamic_rotate %324 by %c14_i32_110 dim 0 : vector<16x32xf32>, i32 -> vector<16x32xf32>
    %cst_111 = arith.constant 0.000000e+00 : f32
    %380 = vector.shape_cast %123 : vector<16x1xi1> to vector<16x1xi1>
    %381 = vector.broadcast %380 : vector<16x1xi1> to vector<16x32xi1>
    %382 = vector.broadcast %cst_111 : f32 to vector<16x32xf32>
    %383 = arith.select %381, %379, %382 : vector<16x32xi1>, vector<16x32xf32>
    %384 = vector.extract_strided_slice %327 {offsets = [6, 0], sizes = [1, 32], strides = [1, 1]} : vector<9x32xf32> to vector<1x32xf32>
    %385 = vector.broadcast %384 : vector<1x32xf32> to vector<16x32xf32>
    %386 = arith.mulf %383, %385 : vector<16x32xf32>
    %387 = arith.addf %378, %386 : vector<16x32xf32>
    %c13_i32_112 = arith.constant 13 : i32
    %388 = tpu.dynamic_rotate %324 by %c13_i32_112 dim 0 : vector<16x32xf32>, i32 -> vector<16x32xf32>
    %cst_113 = arith.constant 0.000000e+00 : f32
    %389 = vector.shape_cast %132 : vector<16x1xi1> to vector<16x1xi1>
    %390 = vector.broadcast %389 : vector<16x1xi1> to vector<16x32xi1>
    %391 = vector.broadcast %cst_113 : f32 to vector<16x32xf32>
    %392 = arith.select %390, %388, %391 : vector<16x32xi1>, vector<16x32xf32>
    %393 = vector.extract_strided_slice %327 {offsets = [7, 0], sizes = [1, 32], strides = [1, 1]} : vector<9x32xf32> to vector<1x32xf32>
    %394 = vector.broadcast %393 : vector<1x32xf32> to vector<16x32xf32>
    %395 = arith.mulf %392, %394 : vector<16x32xf32>
    %396 = arith.addf %387, %395 : vector<16x32xf32>
    %c12_i32_114 = arith.constant 12 : i32
    %397 = tpu.dynamic_rotate %324 by %c12_i32_114 dim 0 : vector<16x32xf32>, i32 -> vector<16x32xf32>
    %cst_115 = arith.constant 0.000000e+00 : f32
    %398 = vector.shape_cast %141 : vector<16x1xi1> to vector<16x1xi1>
    %399 = vector.broadcast %398 : vector<16x1xi1> to vector<16x32xi1>
    %400 = vector.broadcast %cst_115 : f32 to vector<16x32xf32>
    %401 = arith.select %399, %397, %400 : vector<16x32xi1>, vector<16x32xf32>
    %402 = vector.extract_strided_slice %327 {offsets = [8, 0], sizes = [1, 32], strides = [1, 1]} : vector<9x32xf32> to vector<1x32xf32>
    %403 = vector.broadcast %402 : vector<1x32xf32> to vector<16x32xf32>
    %404 = arith.mulf %401, %403 : vector<16x32xf32>
    %405 = arith.addf %396, %404 : vector<16x32xf32>
    %406 = vector.extract_strided_slice %330 {offsets = [0, 0], sizes = [1, 32], strides = [1, 1]} : vector<6x32xf32> to vector<1x32xf32>
    %407 = vector.broadcast %406 : vector<1x32xf32> to vector<16x32xf32>
    %408 = arith.addf %405, %407 : vector<16x32xf32>
    %cst_116 = arith.constant 5.000000e-01 : f32
    %409 = vector.broadcast %cst_116 : f32 to vector<16x32xf32>
    %410 = arith.mulf %409, %408 : vector<16x32xf32>
    %cst_117 = arith.constant 0.707106769 : f32
    %411 = vector.broadcast %cst_117 : f32 to vector<16x32xf32>
    %412 = arith.mulf %408, %411 : vector<16x32xf32>
    %413 = math.absf %412 : vector<16x32xf32>
    %cst_118 = arith.constant 0.327591091 : f32
    %414 = vector.broadcast %cst_118 : f32 to vector<16x32xf32>
    %415 = arith.mulf %414, %413 : vector<16x32xf32>
    %cst_119 = arith.constant 1.000000e+00 : f32
    %416 = vector.broadcast %cst_119 : f32 to vector<16x32xf32>
    %417 = arith.addf %416, %415 : vector<16x32xf32>
    %418 = tpu.reciprocal %417 {approx = true} : vector<16x32xf32> -> vector<16x32xf32>
    %cst_120 = arith.constant 1.06140542 : f32
    %419 = vector.broadcast %cst_120 : f32 to vector<16x32xf32>
    %420 = arith.mulf %419, %418 : vector<16x32xf32>
    %cst_121 = arith.constant -1.45315206 : f32
    %421 = vector.broadcast %cst_121 : f32 to vector<16x32xf32>
    %422 = arith.addf %420, %421 : vector<16x32xf32>
    %423 = arith.mulf %422, %418 : vector<16x32xf32>
    %cst_122 = arith.constant 1.42141378 : f32
    %424 = vector.broadcast %cst_122 : f32 to vector<16x32xf32>
    %425 = arith.addf %423, %424 : vector<16x32xf32>
    %426 = arith.mulf %425, %418 : vector<16x32xf32>
    %cst_123 = arith.constant -0.284496725 : f32
    %427 = vector.broadcast %cst_123 : f32 to vector<16x32xf32>
    %428 = arith.addf %426, %427 : vector<16x32xf32>
    %429 = arith.mulf %428, %418 : vector<16x32xf32>
    %cst_124 = arith.constant 0.254829586 : f32
    %430 = vector.broadcast %cst_124 : f32 to vector<16x32xf32>
    %431 = arith.addf %429, %430 : vector<16x32xf32>
    %432 = arith.mulf %431, %418 : vector<16x32xf32>
    %cst_125 = arith.constant 0.000000e+00 : f32
    %433 = vector.broadcast %cst_125 : f32 to vector<16x32xf32>
    %434 = arith.subf %433, %413 : vector<16x32xf32>
    %435 = arith.mulf %434, %413 : vector<16x32xf32>
    %436 = math.exp %435 : vector<16x32xf32>
    %437 = arith.mulf %432, %436 : vector<16x32xf32>
    %cst_126 = arith.constant 1.000000e+00 : f32
    %438 = vector.broadcast %cst_126 : f32 to vector<16x32xf32>
    %439 = arith.subf %438, %437 : vector<16x32xf32>
    %cst_127 = arith.constant 0.000000e+00 : f32
    %440 = vector.broadcast %cst_127 : f32 to vector<16x32xf32>
    %441 = arith.cmpf oge, %412, %440 : vector<16x32xf32>
    %cst_128 = arith.constant 0.000000e+00 : f32
    %442 = vector.broadcast %cst_128 : f32 to vector<16x32xf32>
    %443 = arith.subf %442, %439 : vector<16x32xf32>
    %444 = arith.select %441, %439, %443 : vector<16x32xi1>, vector<16x32xf32>
    %cst_129 = arith.constant 1.000000e+00 : f32
    %445 = vector.broadcast %cst_129 : f32 to vector<16x32xf32>
    %446 = arith.addf %445, %444 : vector<16x32xf32>
    %447 = arith.mulf %410, %446 : vector<16x32xf32>
    %448 = vector.extract_strided_slice %330 {offsets = [1, 0], sizes = [1, 32], strides = [1, 1]} : vector<6x32xf32> to vector<1x32xf32>
    %449 = vector.broadcast %448 : vector<1x32xf32> to vector<16x32xf32>
    %450 = arith.mulf %447, %449 : vector<16x32xf32>
    %451 = vector.extract_strided_slice %330 {offsets = [2, 0], sizes = [1, 32], strides = [1, 1]} : vector<6x32xf32> to vector<1x32xf32>
    %452 = vector.broadcast %451 : vector<1x32xf32> to vector<16x32xf32>
    %453 = arith.addf %450, %452 : vector<16x32xf32>
    %454 = arith.addf %453, %324 : vector<16x32xf32>
    %455 = arith.truncf %454 : vector<16x32xf32> to vector<16x32xbf16>
    %456 = arith.index_cast %c1_i32_95 : i32 to index
    %c0_130 = arith.constant 0 : index
    %c0_131 = arith.constant 0 : index
    %457 = vector.load %arg6[%456, %c0_130, %c0_131] : memref<2x32x32xbf16, #tpu.memory_space<vmem>>, vector<1x32x32xbf16>
    %458 = vector.shape_cast %457 : vector<1x32x32xbf16> to vector<32x32xbf16>
    %cst_132 = arith.constant dense<0.000000e+00> : vector<16x32xf32>
    %459 = tpu.matmul %455, %458, %cst_132 {dimension_numbers = #tpu.dot_dimension_numbers<[1], [0], [0], [1], [0, 0, 1, 1], [], []>} : vector<16x32xbf16>, vector<32x32xbf16>, vector<16x32xf32> -> vector<16x32xf32>
    %460 = vector.extract_strided_slice %330 {offsets = [3, 0], sizes = [1, 32], strides = [1, 1]} : vector<6x32xf32> to vector<1x32xf32>
    %461 = vector.broadcast %460 : vector<1x32xf32> to vector<16x32xf32>
    %462 = arith.addf %459, %461 : vector<16x32xf32>
    %cst_133 = arith.constant 5.000000e-01 : f32
    %463 = vector.broadcast %cst_133 : f32 to vector<16x32xf32>
    %464 = arith.mulf %463, %462 : vector<16x32xf32>
    %cst_134 = arith.constant 0.707106769 : f32
    %465 = vector.broadcast %cst_134 : f32 to vector<16x32xf32>
    %466 = arith.mulf %462, %465 : vector<16x32xf32>
    %467 = math.absf %466 : vector<16x32xf32>
    %cst_135 = arith.constant 0.327591091 : f32
    %468 = vector.broadcast %cst_135 : f32 to vector<16x32xf32>
    %469 = arith.mulf %468, %467 : vector<16x32xf32>
    %cst_136 = arith.constant 1.000000e+00 : f32
    %470 = vector.broadcast %cst_136 : f32 to vector<16x32xf32>
    %471 = arith.addf %470, %469 : vector<16x32xf32>
    %472 = tpu.reciprocal %471 {approx = true} : vector<16x32xf32> -> vector<16x32xf32>
    %cst_137 = arith.constant 1.06140542 : f32
    %473 = vector.broadcast %cst_137 : f32 to vector<16x32xf32>
    %474 = arith.mulf %473, %472 : vector<16x32xf32>
    %cst_138 = arith.constant -1.45315206 : f32
    %475 = vector.broadcast %cst_138 : f32 to vector<16x32xf32>
    %476 = arith.addf %474, %475 : vector<16x32xf32>
    %477 = arith.mulf %476, %472 : vector<16x32xf32>
    %cst_139 = arith.constant 1.42141378 : f32
    %478 = vector.broadcast %cst_139 : f32 to vector<16x32xf32>
    %479 = arith.addf %477, %478 : vector<16x32xf32>
    %480 = arith.mulf %479, %472 : vector<16x32xf32>
    %cst_140 = arith.constant -0.284496725 : f32
    %481 = vector.broadcast %cst_140 : f32 to vector<16x32xf32>
    %482 = arith.addf %480, %481 : vector<16x32xf32>
    %483 = arith.mulf %482, %472 : vector<16x32xf32>
    %cst_141 = arith.constant 0.254829586 : f32
    %484 = vector.broadcast %cst_141 : f32 to vector<16x32xf32>
    %485 = arith.addf %483, %484 : vector<16x32xf32>
    %486 = arith.mulf %485, %472 : vector<16x32xf32>
    %cst_142 = arith.constant 0.000000e+00 : f32
    %487 = vector.broadcast %cst_142 : f32 to vector<16x32xf32>
    %488 = arith.subf %487, %467 : vector<16x32xf32>
    %489 = arith.mulf %488, %467 : vector<16x32xf32>
    %490 = math.exp %489 : vector<16x32xf32>
    %491 = arith.mulf %486, %490 : vector<16x32xf32>
    %cst_143 = arith.constant 1.000000e+00 : f32
    %492 = vector.broadcast %cst_143 : f32 to vector<16x32xf32>
    %493 = arith.subf %492, %491 : vector<16x32xf32>
    %cst_144 = arith.constant 0.000000e+00 : f32
    %494 = vector.broadcast %cst_144 : f32 to vector<16x32xf32>
    %495 = arith.cmpf oge, %466, %494 : vector<16x32xf32>
    %cst_145 = arith.constant 0.000000e+00 : f32
    %496 = vector.broadcast %cst_145 : f32 to vector<16x32xf32>
    %497 = arith.subf %496, %493 : vector<16x32xf32>
    %498 = arith.select %495, %493, %497 : vector<16x32xi1>, vector<16x32xf32>
    %cst_146 = arith.constant 1.000000e+00 : f32
    %499 = vector.broadcast %cst_146 : f32 to vector<16x32xf32>
    %500 = arith.addf %499, %498 : vector<16x32xf32>
    %501 = arith.mulf %464, %500 : vector<16x32xf32>
    %502 = vector.extract_strided_slice %330 {offsets = [4, 0], sizes = [1, 32], strides = [1, 1]} : vector<6x32xf32> to vector<1x32xf32>
    %503 = vector.broadcast %502 : vector<1x32xf32> to vector<16x32xf32>
    %504 = arith.mulf %501, %503 : vector<16x32xf32>
    %505 = vector.extract_strided_slice %330 {offsets = [5, 0], sizes = [1, 32], strides = [1, 1]} : vector<6x32xf32> to vector<1x32xf32>
    %506 = vector.broadcast %505 : vector<1x32xf32> to vector<16x32xf32>
    %507 = arith.addf %504, %506 : vector<16x32xf32>
    %c2_i32_147 = arith.constant 2 : i32
    %c0_148 = arith.constant 0 : index
    %c0_149 = arith.constant 0 : index
    %508 = vector.load %arg7[%c0_148, %c0_149] : memref<1x16xbf16, #tpu.memory_space<vmem>>, vector<1x16xbf16>
    %509 = arith.truncf %507 : vector<16x32xf32> to vector<16x32xbf16>
    %cst_150 = arith.constant dense<0.000000e+00> : vector<1x32xf32>
    %510 = tpu.matmul %508, %509, %cst_150 {dimension_numbers = #tpu.dot_dimension_numbers<[1], [0], [0], [1], [0, 0, 1, 1], [], []>} : vector<1x16xbf16>, vector<16x32xbf16>, vector<1x32xf32> -> vector<1x32xf32>
    %511 = arith.truncf %510 : vector<1x32xf32> to vector<1x32xbf16>
    %c0_151 = arith.constant 0 : index
    %c0_152 = arith.constant 0 : index
    %512 = vector.load %arg8[%c0_151, %c0_152] : memref<32x2xbf16, #tpu.memory_space<vmem>>, vector<32x2xbf16>
    %cst_153 = arith.constant dense<0.000000e+00> : vector<1x2xf32>
    %513 = tpu.matmul %511, %512, %cst_153 {dimension_numbers = #tpu.dot_dimension_numbers<[1], [0], [0], [1], [0, 0, 1, 1], [], []>} : vector<1x32xbf16>, vector<32x2xbf16>, vector<1x2xf32> -> vector<1x2xf32>
    %c0_154 = arith.constant 0 : index
    %c0_155 = arith.constant 0 : index
    %514 = vector.load %arg9[%c0_154, %c0_155] : memref<1x2xf32, #tpu.memory_space<vmem>>, vector<1x2xf32>
    %515 = arith.addf %513, %514 : vector<1x2xf32>
    %cst_156 = arith.constant dense<0xFF800000> : vector<1xf32>
    %516 = vector.multi_reduction <maximumf>, %515, %cst_156 [1] : vector<1x2xf32> to vector<1xf32>
    %517 = vector.shape_cast %516 : vector<1xf32> to vector<1x1xf32>
    %518 = vector.broadcast %517 : vector<1x1xf32> to vector<1x2xf32>
    %519 = arith.subf %515, %518 : vector<1x2xf32>
    %520 = math.exp %519 : vector<1x2xf32>
    %cst_157 = arith.constant dense<0.000000e+00> : vector<1xf32>
    %521 = vector.multi_reduction <add>, %520, %cst_157 [1] : vector<1x2xf32> to vector<1xf32>
    %522 = vector.shape_cast %521 : vector<1xf32> to vector<1x1xf32>
    %523 = math.log %522 : vector<1x1xf32>
    %524 = vector.broadcast %523 : vector<1x1xf32> to vector<1x2xf32>
    %525 = arith.subf %519, %524 : vector<1x2xf32>
    %c0_158 = arith.constant 0 : index
    %c0_159 = arith.constant 0 : index
    %c0_160 = arith.constant 0 : index
    %526 = vector.load %arg10[%c0_158, %c0_159, %c0_160] : memref<1x1x2xf32, #tpu.memory_space<vmem>>, vector<1x1x2xf32>
    %527 = vector.shape_cast %526 : vector<1x1x2xf32> to vector<1x2xf32>
    %528 = vector.shape_cast %525 : vector<1x2xf32> to vector<1x1x2xf32>
    tpu.vector_store %arg10[%c0_158, %c0_159, %c0_160], %528 {strides = array<i32>} : memref<1x1x2xf32, #tpu.memory_space<vmem>>, vector<1x1x2xf32>,
    return
  }
  func.func @transform_0(%arg0: i32) -> (i32, i32) {
    %c0_i32 = arith.constant 0 : i32
    %c0_i32_0 = arith.constant 0 : i32
    return %arg0, %c0_i32 : i32, i32
  }
  func.func @transform_1(%arg0: i32) -> (i32, i32) {
    %c0_i32 = arith.constant 0 : i32
    %c0_i32_0 = arith.constant 0 : i32
    %c0_i32_1 = arith.constant 0 : i32
    return %c0_i32, %c0_i32_0 : i32, i32
  }
  func.func @transform_2(%arg0: i32) -> (i32, i32) {
    %c0_i32 = arith.constant 0 : i32
    %c0_i32_0 = arith.constant 0 : i32
    %c0_i32_1 = arith.constant 0 : i32
    return %c0_i32, %c0_i32_0 : i32, i32
  }
  func.func @transform_3(%arg0: i32) -> (i32, i32, i32) {
    %c0_i32 = arith.constant 0 : i32
    %c0_i32_0 = arith.constant 0 : i32
    %c0_i32_1 = arith.constant 0 : i32
    %c0_i32_2 = arith.constant 0 : i32
    return %c0_i32, %c0_i32_0, %c0_i32_1 : i32, i32, i32
  }
  func.func @transform_4(%arg0: i32) -> (i32, i32, i32) {
    %c0_i32 = arith.constant 0 : i32
    %c0_i32_0 = arith.constant 0 : i32
    %c0_i32_1 = arith.constant 0 : i32
    %c0_i32_2 = arith.constant 0 : i32
    return %c0_i32, %c0_i32_0, %c0_i32_1 : i32, i32, i32
  }
  func.func @transform_5(%arg0: i32) -> (i32, i32, i32) {
    %c0_i32 = arith.constant 0 : i32
    %c0_i32_0 = arith.constant 0 : i32
    %c0_i32_1 = arith.constant 0 : i32
    %c0_i32_2 = arith.constant 0 : i32
    return %c0_i32, %c0_i32_0, %c0_i32_1 : i32, i32, i32
  }
  func.func @transform_6(%arg0: i32) -> (i32, i32) {
    %c0_i32 = arith.constant 0 : i32
    %c0_i32_0 = arith.constant 0 : i32
    %c0_i32_1 = arith.constant 0 : i32
    return %c0_i32, %c0_i32_0 : i32, i32
  }
  func.func @transform_7(%arg0: i32) -> (i32, i32) {
    %c0_i32 = arith.constant 0 : i32
    %c0_i32_0 = arith.constant 0 : i32
    %c0_i32_1 = arith.constant 0 : i32
    return %c0_i32, %c0_i32_0 : i32, i32
  }
  func.func @transform_8(%arg0: i32) -> (i32, i32) {
    %c0_i32 = arith.constant 0 : i32
    %c0_i32_0 = arith.constant 0 : i32
    %c0_i32_1 = arith.constant 0 : i32
    return %c0_i32, %c0_i32_0 : i32, i32
  }
  func.func @transform_9(%arg0: i32) -> (i32, i32, i32) {
    %c0_i32 = arith.constant 0 : i32
    %c0_i32_0 = arith.constant 0 : i32
    %c0_i32_1 = arith.constant 0 : i32
    return %arg0, %c0_i32, %c0_i32_0 : i32, i32, i32
  }
}

</mosaic_0001>

<bundles_post_ra>
// kernel: convmixer_forward.1
= control target key start
LH: loop header
LB: loop body
LE: loop exit
PB: predicated region body
PF: predicated region fallthrough
CT: control target
= control target key end

     0   :  { %14 = vsyncpa [#allocation3], 0  ;;  %s2158_s0 = inlined_call_operand.vmem [shape: f32[32,28], index: 0, kind: input, shape index: {}]   ;;  %s2159_s1 = inlined_call_operand.vmem [shape: bf16[28,32], index: 1, kind: input, shape index: {}]   ;;  %s2160_s2 = inlined_call_operand.vmem [shape: f32[3,32], index: 2, kind: input, shape index: {}]   ;;  %s2161_s3 = inlined_call_operand.vmem [shape: f32[2,9,32], index: 3, kind: input, shape index: {}]   ;;  %s2162_s4 = inlined_call_operand.vmem [shape: f32[2,6,32], index: 4, kind: input, shape index: {}]   ;;  %s2163_s5 = inlined_call_operand.vmem [shape: bf16[2,32,32], index: 5, kind: input, shape index: {}]   ;;  %s2164_s6 = inlined_call_operand.vmem [shape: bf16[1,16], index: 6, kind: input, shape index: {}]   ;;  %s2165_s7 = inlined_call_operand.vmem [shape: bf16[32,2], index: 7, kind: input, shape index: {}]   ;;  %s2166_s8 = inlined_call_operand.vmem [shape: f32[1,2], index: 8, kind: input, shape index: {}]   ;;  %s2167_s9 = inlined_call_operand.hbm [shape: f32[2,1,2], index: 9, kind: output, shape index: {}]  }
   0x1   :  { %16 = vsyncpa [#allocation3 + $0x1], 0  ;;  %s1719_s30 = smov 0   ;;  %s1721_s10 = smov 0  }
   0x2   :  { %s1723_s11 = smov 0   ;;  %s1725_s12 = smov 0  }
   0x3 LB: > { %s1740_s13 = sadd.s32 4294967295, %s1664_s12   ;;  %s1428_s14 = sadd.s32 4294967294, %s1664_s12   ;;  %s1664_s12 = sphi %s1725_s12, %s2179_s12   ;;  %s1660_s11 = sphi %s1723_s11, %s2178_s11   ;;  %s1656_s10 = sphi %s1721_s10, %s2177_s10   ;;  %s1652_s30 = sphi %s1719_s30, %s2176_s30  }
   0x4   : > { %s1744_s15 = sadd.s32 1, %s1664_s12   ;;  %s223_s16 = sadd.s32 1, %s1660_s11 }
   0x5   : > { %s220_s17 = ssub.s32 %s1664_s12, %s1744_s15  ;;  %p233_p0 = scmp.ne.s32.totalorder %s1660_s11, %s1656_s10 }
   0x6   : > { %p221_p1 = scmp.eq.s32.totalorder %s220_s17, 0  ;;  %p234_p2 = scmp.eq.s32.totalorder %s1740_s13, 1 }
   0x7   : > { %p239_p3 = scmp.ne.s32.totalorder %s1656_s10, %s1652_s30  ;;  %p240_p4 = scmp.eq.s32.totalorder %s1428_s14, 1 }
   0x8   : > { %s1755_s18 = scalar_select %p221_p1, %s1660_s11, %s223_s16  }
   0x9   : > { %p1757_p5 = por %p234_p2, %p233_p0  ;;  %p1761_p6 = por %p240_p4, %p239_p3 }
   0xa   : > { %p1431_p7 = scmp.ge.s32.totalorder %s1664_s12, 1  ;;  %p291_p8 = scmp.lt.s32.totalorder %s1664_s12, 3 }
   0xc   : > { %p292_p9 = pnand %p1431_p7, %p291_p8 }
   0xd   : > { %s1432_s23 = sshll.u32 (!%p292_p9), %s1740_s13, 1  ;;  %s324_s24 = sand.u32 (!%p292_p9), 1, %s1656_s10  }
   0xe   : > { %295 = sbr.rel (%p292_p9) target bundleno = 1679 (0x68f), region = 56  ;;  %p327_p10 = scmp.lt.s32.totalorder (!%p292_p9), %s1432_s23, 3 }
   0xf   : > { %s1456_s25 = sshll.u32 (!%p292_p9), %s1740_s13, 4  ;;  %s1361_s16 = scalar_lea.sflag (!%p292_p9), [#allocation3], %s324_s24 }
  0x10   : > { %s1371_s14 = scalar_lea.hbm (!%p292_p9), %s2167_s9, %s1456_s25  ;;  %s1668_s21 = smov (!%p292_p9), [#allocation2]  }
  0x11   : > { %s1608_s22 = sshll.u32 (!%p292_p9), %s1668_s21, 4  ;;  %s1609_s22 = int_to_ptr.vmem [resolvable:$false] %s1608_s22 }
  0x12   : > { %s1610_s13 = scalar_lea.vmem (!%p292_p9), %s1609_s22, 32 }
  0x13   : > { %vm360_vm0 = vcmask 1045504   ;;  %v1666_v0 = vmov 0.0   ;;  %v1552_v1 = vld [vmem:[%s2159_s1 + $0x8] sm:$0x3f]   ;;  %v1553_v3 = vld [vmem:[%s2159_s1] sm:$0xff]   ;;  %vm2170_vm1 = vmmov 0   ;;  %v341_v9 = vlaneseq }
  0x14   : > { %1473 = vmatprep.subr.bf16.mxu0 %v1666_v0  ;;  %1481 = vmatprep.subr.bf16.mxu1 %v1666_v0  ;;  %v362_v2 = vsel %vm360_vm0, %v1552_v1, 0  ;;  %s2181_s23 = smov (!%p327_p10, %s1432_s23), 3  ;;  %vm356_vm2 = vcmask 228352   ;;  %v1554_v7 = vld [vmem:[%s2163_s5 + $0x8] sm:$0xff]   ;;  %v1555_v8 = vld [vmem:[%s2163_s5] sm:$0xff]  }
  0x15   : > { %1477 = vmatprep.mubr.msk.bf16.mxu0 %vm2170_vm1, %v1666_v0  ;;  %1485 = vmatprep.mubr.msk.bf16.mxu1 %vm2170_vm1, %v1666_v0  ;;  %s1433_s26 = sshll.u32 %s2181_s23, 3  ;;  %v1795_v10 = vshrl.u32 %v341_v9, 7  ;;  %v1803_v12 = vld [vmem:[%s2160_s2] sm:$0x7] }
  0x16   : > { %1474 = vmatpush3.bf16.msra.mxu0 %v362_v2  ;;  %s330_s29 = scalar_lea.vmem %s2158_s0, %s1433_s26  ;;  %1482 = vmatpush3.bf16.msra.mxu1 %v1554_v7  ;;  %v1826_v2 = vld [vmem:[%s2161_s3] sm:$0xff]  ;;  %s325_s26 = scalar_lea.vmem [#allocation2], %s324_s24 }
  0x17   : > { %1475 = vmatprep.subr.bf16.mxu0 %v1666_v0  ;;  %v334_v4 = vld [vmem:[%s330_s29] sm:$0xff]  ;;  %v335_v5 = vld [vmem:[%s330_s29 + $0x8] sm:$0xff]  ;;  %1483 = vmatprep.subr.bf16.mxu1 %v1666_v0  ;;  %v1798_v11 = vsub.s32 0, %v1795_v10  ;;  %v1814_v58 = vsub.s32 1, %v1795_v10  ;;  %v1817_v60 = vsub.s32 2, %v1795_v10  ;;  %v471_v62 = vadd.s32 8, %v1795_v10 }
  0x18   : > { %v336_v6 = vpack.c.bf16 %v335_v5, %v334_v4  ;;  %v1821_v63 = vsub.s32 4, %v1795_v10  ;;  %v476_v4 = vand.u32 15, %v1795_v10  ;;  %vm571_vm9 = vcmp.lt.s32.totalorder %v1795_v10, 4  ;;  %s1373_s27 = sshll.u32 %s325_s26, 4  ;;  %s1374_s27 = int_to_ptr.vmem [resolvable:$true] %s1373_s27 }
  0x19   : > { %v344_v13 = vrot.slane %v1803_v12, %v1798_v11  ;;  %v460_v7 = vrot.slane %v1803_v12, %v1814_v58  ;;  %v1835_v9 = vrot.slane %v1826_v2, %v1814_v58  ;;  %vm590_vm10 = vcmp.lt.s32.totalorder %v1795_v10, 3  ;;  %s1604_s17 = scalar_lea.vmem %s1374_s27, 16  ;;  %p1611_p0 = scmp.lt.s32.totalorder %s1374_s27, %s1609_s22 }
  0x1a   : > { %1476 = vmatpush3.bf16.msra.mxu0 %v1553_v3  ;;  %1484 = vmatpush3.bf16.msra.mxu1 %v1555_v8  ;;  %v466_v8 = vrot.slane %v1803_v12, %v1817_v60  ;;  %v1846_v12 = vadd.s32 4294967293, %v476_v4  ;;  %vm609_vm12 = vcmp.lt.s32.totalorder %v1795_v10, 2  ;;  %vm628_vm13 = vcmp.lt.s32.totalorder %v1795_v10, 1  ;;  %p1605_p11 = scmp.ne.s32.totalorder %s1374_s27, %s1604_s17  ;;  %p1612_p1 = scmp.lt.s32.totalorder %s1610_s13, %s1604_s17 }
  0x1b   : > { %1489 = vmatprep.subr.bf16.mxu0 %v1666_v0  ;;  %1497 = vmatprep.subr.bf16.mxu1 %v1666_v0  ;;  %vm647_vm14 = vcmp.lt.s32.totalorder %v1795_v10, 7  ;;  %vm666_vm15 = vcmp.lt.s32.totalorder %v1795_v10, 6 }
  0x1c   : > { %vm506_vm6 = vcmp.ge.s32.totalorder %v1846_v12, 0  ;;  %p1606_p12 = pnand %p1605_p11, %p1757_p5  ;;  %p1613_p2 = por %p1612_p1, %p1611_p0 }
  0x1d   : > { %1478 = vmatmul.mubr.msk.bf16.vlgmr.msra.gmra.mxu0 %vm356_vm2, %v336_v6  ;;  %vm685_vm2 = vcmp.lt.s32.totalorder %v1795_v10, 5 }
  0x1e   : > { %1493 = vmatprep.mubr.msk.bf16.mxu0 %vm2170_vm1, %v1666_v0  ;;  %p1607_p13 = pneg %p1606_p12 }
  0x20   : > { %p1614_p3 = pnand %p1613_p2, %p1607_p13 }
  0xdd   : > { %v398_v14 = vpop.f32.mrf.mxu0 }
  0xde   : > { %v399_v15 = vadd.f32 %v398_v14, %v344_v13  ;;  %v483_v14 = vand.u32 15, %v471_v62 }
  0xdf   : > { %v1479_v16 = vpop.f32.mrf.mxu0 }
  0xe0   : > { %v407_v17 = vmul.f32 0.70710677, %v399_v15  ;;  %v405_v5 = vmul.f32 0.5, %v399_v15  ;;  %v566_v15 = vrot.slane %v1826_v2, %v1821_v63 }
  0xe1   : > { %v401_v18 = vpop.f32.mrf.mxu0 }
  0xe2   : > { %v409_v19 = vand.u32 2147483647, %v407_v17  ;;  %v1807_v20 = vadd.f32 %v401_v18, %v344_v13  ;;  %vm447_vm3 = vcmp.ge.f32.partialorder %v407_v17, 0.0  ;;  %v1839_v17 = vrot.slane %v1826_v2, %v1817_v60 }
  0xe3   : > { %v1480_v21 = vpop.f32.mrf.mxu0 }
  0xe4   : > { %v411_v22 = vmul.f32 0.3275911, %v409_v19  ;;  %v1810_v23 = vmul.f32 0.70710677, %v1807_v20  ;;  %v435_v28 = vsub.f32 0.0, %v409_v19  ;;  %v1848_v21 = vadd.s32 4294967294, %v476_v4 }
  0xe6   : > { %v413_v24 = vadd.f32 1.0, %v411_v22  ;;  %v410_v25 = vand.u32 2147483647, %v1810_v23  ;;  %v437_v29 = vmul.f32 %v435_v28, %v409_v19  ;;  %vm448_vm4 = vcmp.ge.f32.partialorder %v1810_v23, 0.0 }
  0xe7   : > { %v1844_v19 = vadd.s32 4294967292, %v476_v4  ;;  %v1855_v28 = vadd.s32 2, %v483_v14  ;;  %v1857_v23 = vadd.s32 3, %v483_v14  ;;  %vm514_vm7 = vcmp.ge.s32.totalorder %v1848_v21, 0 }
  0xe8   : > { %1560 = vrcp.f32 %v413_v24  ;;  %v412_v26 = vmul.f32 0.3275911, %v410_v25  ;;  %v436_v30 = vsub.f32 0.0, %v410_v25  ;;  %v439_v33 = vmul.f32 1.442695, %v437_v29 }
  0xe9   : > { %v406_v24 = vmul.f32 0.5, %v1807_v20  ;;  %v1860_v29 = vsub.s32 3, %v1795_v10  ;;  %v677_v20 = vsub.s32 6, %v1795_v10  ;;  %vm498_vm5 = vcmp.ge.s32.totalorder %v1844_v19, 0 }
  0xea   : > { %v414_v27 = vadd.f32 1.0, %v412_v26  ;;  %v438_v34 = vmul.f32 %v436_v30, %v410_v25  ;;  %v1851_v26 = vadd.s32 4294967295, %v476_v4  ;;  %vm541_vm0 = vcmp.lt.s32.totalorder %v1855_v28, 16 }
  0xec   : > { %1562 = vrcp.f32 %v414_v27  ;;  %v441_v39 = vmul.f32 1.442695, %v438_v34  ;;  %v1853_v27 = vadd.s32 1, %v483_v14  ;;  %vm522_vm8 = vcmp.ge.s32.totalorder %v1851_v26, 0 }
  0xed   : > { %1564 = vpow2.f32 %v439_v33 }
  0xee   : > { %1566 = vpow2.f32 %v441_v39  ;;  %vm533_vm11 = vcmp.lt.s32.totalorder %v1853_v27, 16  ;;  %v1892_v39 = vrot.slane %v1826_v2, %v677_v20 }
  0xf5   : > { %v1561_v31 = vpop.eup %1560 }
  0xf6   : > { %v417_v32 = vmul.f32 1.0614054, %v1561_v31 }
  0xf8   : > { %v419_v35 = vadd.f32 -1.4531521, %v417_v32  ;;  %v1865_v32 = vsub.s32 5, %v1795_v10 }
  0xf9   : > { %v1563_v36 = vpop.eup %1562 }
  0xfa   : > { %v421_v37 = vmul.f32 %v1561_v31, %v419_v35  ;;  %v418_v38 = vmul.f32 1.0614054, %v1563_v36  ;;  %v1565_v52 = vpop.eup %1564  ;;  %v583_v35 = vrot.slane %v1826_v2, %v1798_v11 }
  0xfb   : > { %v1567_v57 = vpop.eup %1566 }
  0xfc   : > { %v423_v40 = vadd.f32 1.4214138, %v421_v37  ;;  %v420_v41 = vadd.f32 -1.4531521, %v418_v38  ;;  %v659_v38 = vrot.slane %v1826_v2, %v1865_v32 }
  0xfe   : > { %v425_v42 = vmul.f32 %v1561_v31, %v423_v40  ;;  %v422_v43 = vmul.f32 %v1563_v36, %v420_v41  ;;  %v696_v40 = vsub.s32 7, %v1795_v10 }
 0x100   : > { %v427_v44 = vadd.f32 -0.28449672, %v425_v42  ;;  %v424_v45 = vadd.f32 1.4214138, %v422_v43 }
 0x102   : > { %v429_v46 = vmul.f32 %v1561_v31, %v427_v44  ;;  %v426_v47 = vmul.f32 %v1563_v36, %v424_v45 }
 0x104   : > { %v431_v48 = vadd.f32 0.2548296, %v429_v46  ;;  %v428_v49 = vadd.f32 -0.28449672, %v426_v47 }
 0x106   : > { %v433_v50 = vmul.f32 %v1561_v31, %v431_v48  ;;  %v430_v51 = vmul.f32 %v1563_v36, %v428_v49  ;;  %v1862_v31 = vadd.s32 4, %v483_v14 }
 0x108   : > { %v443_v53 = vmul.f32 %v1565_v52, %v433_v50  ;;  %v432_v54 = vadd.f32 0.2548296, %v430_v51 }
 0x10a   : > { %v445_v55 = vsub.f32 1.0, %v443_v53  ;;  %v434_v56 = vmul.f32 %v1563_v36, %v432_v54  ;;  %v640_v36 = vrot.slane %v1826_v2, %v1860_v29 }
 0x10c   : > { %v449_v59 = vsub.f32 0.0, %v445_v55  ;;  %v444_v61 = vmul.f32 %v1567_v57, %v434_v56 }
 0x10e   : > { %v451_v1 = vsel %vm447_vm3, %v445_v55, %v449_v59  ;;  %v446_v3 = vsub.f32 1.0, %v444_v61  ;;  %vm2169_vm3 = vcmp.lt.s32.totalorder %v1857_v23, 16 }
 0x10f   : > { %v453_v6 = vadd.f32 1.0, %v451_v1 }
 0x110   : > { %v450_v13 = vsub.f32 0.0, %v446_v3 }
 0x111   : > { %v455_v16 = vmul.f32 %v453_v6, %v405_v5 }
 0x112   : > { %v452_v18 = vsel %vm448_vm4, %v446_v3, %v450_v13  ;;  %vm2168_vm4 = vcmp.lt.s32.totalorder %v1862_v31, 16 }
 0x113   : > { %v461_v22 = vmul.f32 %v460_v7, %v455_v16  ;;  %v454_v25 = vadd.f32 1.0, %v452_v18 }
 0x115   : > { %v456_v30 = vmul.f32 %v454_v25, %v406_v24  ;;  %v1868_v33 = vadd.f32 %v466_v8, %v461_v22 }
 0x117   : > { %v462_v34 = vmul.f32 %v460_v7, %v456_v30  ;;  %v567_v41 = vmul.f32 %v566_v15, %v1868_v33  ;;  %v569_v42 = vrot.slane %v1868_v33, 4  ;;  %v588_v43 = vrot.slane %v1868_v33, 5 }
 0x118   : > { %v607_v44 = vrot.slane %v1868_v33, 6  ;;  %v626_v48 = vrot.slane %v1868_v33, 7  ;;  %v645_v51 = vrot.slane %v1868_v33, 1  ;;  %v664_v52 = vrot.slane %v1868_v33, 2 }
 0x119   : > { %v1884_v37 = vadd.f32 %v466_v8, %v462_v34 }
 0x11b   : > { %v570_v45 = vrot.slane %v1884_v37, 4  ;;  %v589_v46 = vrot.slane %v1884_v37, 5  ;;  %v608_v47 = vrot.slane %v1884_v37, 6  ;;  %v568_v49 = vmul.f32 %v566_v15, %v1884_v37 }
 0x11c   : > { %v627_v50 = vrot.slane %v1884_v37, 7  ;;  %v646_v62 = vrot.slane %v1884_v37, 1  ;;  %v665_v5 = vrot.slane %v1884_v37, 2  ;;  %v684_v13 = vrot.slane %v1884_v37, 3 }
 0x11d   : > { %v572_v53 = vsel %vm571_vm9, %v569_v42, %v570_v45  ;;  %v573_v54 = vsel %vm571_vm9, %v570_v45, %v569_v42  ;;  %v591_v55 = vsel %vm590_vm10, %v588_v43, %v589_v46  ;;  %v592_v56 = vsel %vm590_vm10, %v589_v46, %v588_v43 }
 0x11e   : > { %v578_v57 = vsel %vm498_vm5, %v573_v54, 0.0  ;;  %v585_v59 = vmul.f32 %v583_v35, %v572_v53  ;;  %v597_v61 = vsel %vm506_vm6, %v592_v56, 0.0  ;;  %v610_v3 = vsel %vm609_vm12, %v607_v44, %v608_v47 }
 0x11f   : > { %v584_v1 = vmul.f32 %v583_v35, %v578_v57  ;;  %v611_v4 = vsel %vm609_vm12, %v608_v47, %v607_v44  ;;  %v604_v7 = vmul.f32 %v1835_v9, %v591_v55  ;;  %v603_v16 = vmul.f32 %v1835_v9, %v597_v61 }
 0x120   : > { %v587_v6 = vadd.f32 %v585_v59, %v568_v49  ;;  %v616_v8 = vsel %vm514_vm7, %v611_v4, 0.0  ;;  %v629_v15 = vsel %vm628_vm13, %v626_v48, %v627_v50  ;;  %v630_v18 = vsel %vm628_vm13, %v627_v50, %v626_v48 }
 0x121   : > { %v586_v14 = vadd.f32 %v584_v1, %v567_v41  ;;  %v623_v24 = vmul.f32 %v1839_v17, %v610_v3  ;;  %v635_v25 = vsel %vm522_vm8, %v630_v18, 0.0  ;;  %v649_v30 = vsel %vm647_vm14, %v646_v62, %v645_v51 }
 0x122   : > { %v606_v22 = vadd.f32 %v604_v7, %v587_v6  ;;  %v622_v35 = vmul.f32 %v1839_v17, %v616_v8  ;;  %v655_v9 = vsel %vm533_vm11, %v649_v30, 0.0  ;;  %v683_v41 = vrot.slane %v1868_v33, 3 }
 0x123   : > { %v605_v34 = vadd.f32 %v603_v16, %v586_v14  ;;  %v642_v43 = vmul.f32 %v640_v36, %v629_v15  ;;  %v648_v44 = vsel %vm647_vm14, %v645_v51, %v646_v62  ;;  %v668_v45 = vsel %vm666_vm15, %v665_v5, %v664_v52 }
 0x124   : > { %v625_v42 = vadd.f32 %v623_v24, %v606_v22  ;;  %v641_v47 = vmul.f32 %v640_v36, %v635_v25  ;;  %v674_v48 = vsel %vm541_vm0, %v668_v45, 0.0  ;;  %v697_v17 = vrot.slane %v1826_v2, %v696_v40  ;;  %v1437_v2 = vld [vmem:[%s2161_s3 + $0x8] ss:$0 sm:$0xff] }
 0x125   : > { %v624_v46 = vadd.f32 %v622_v35, %v605_v34  ;;  %v661_v50 = vmul.f32 %v659_v38, %v655_v9  ;;  %v667_v55 = vsel %vm666_vm15, %v664_v52, %v665_v5  ;;  %v687_v51 = vsel %vm685_vm2, %v684_v13, %v683_v41  ;;  %v1971_v52 = vld [vmem:[%s2162_s4] sm:$0x3f] }
 0x126   : > { %v644_v49 = vadd.f32 %v642_v43, %v625_v42  ;;  %v660_v57 = vmul.f32 %v659_v38, %v648_v44  ;;  %v693_v36 = vsel %vm2169_vm3, %v687_v51, 0.0  ;;  %v680_v61 = vmul.f32 %v1892_v39, %v674_v48 }
 0x127   : > { %v643_v56 = vadd.f32 %v641_v47, %v624_v46  ;;  %v686_v62 = vsel %vm685_vm2, %v683_v41, %v684_v13  ;;  %v679_v38 = vmul.f32 %v1892_v39, %v667_v55  ;;  %v707_v3 = vsel %vm2168_vm4, %v573_v54, 0.0 }
 0x128   : > { %v663_v59 = vadd.f32 %v661_v50, %v644_v49  ;;  %v699_v5 = vmul.f32 %v697_v17, %v693_v36  ;;  %v698_v7 = vmul.f32 %v697_v17, %v686_v62  ;;  %v713_v13 = vmul.f32 %v1437_v2, %v707_v3 }
 0x129   : > { %v662_v1 = vadd.f32 %v660_v57, %v643_v56  ;;  %v719_v14 = vrot.slane %v1971_v52, %v1798_v11  ;;  %v712_v15 = vmul.f32 %v1437_v2, %v572_v53 }
 0x12a   : > { %v682_v4 = vadd.f32 %v680_v61, %v663_v59 }
 0x12b   : > { %v681_v6 = vadd.f32 %v679_v38, %v662_v1 }
 0x12c   : > { %v701_v8 = vadd.f32 %v699_v5, %v682_v4 }
 0x12d   : > { %v700_v16 = vadd.f32 %v698_v7, %v681_v6 }
 0x12e   : > { %v715_v18 = vadd.f32 %v713_v13, %v701_v8 }
 0x12f   : > { %v714_v22 = vadd.f32 %v712_v15, %v700_v16 }
 0x130   : > { %v721_v24 = vadd.f32 %v719_v14, %v715_v18 }
 0x131   : > { %v720_v25 = vadd.f32 %v719_v14, %v714_v22 }
 0x132   : > { %v725_v30 = vmul.f32 0.70710677, %v721_v24 }
 0x133   : > { %v724_v39 = vmul.f32 0.70710677, %v720_v25 }
 0x134   : > { %v727_v34 = vand.u32 2147483647, %v725_v30  ;;  %vm765_vm4 = vcmp.ge.f32.partialorder %v725_v30, 0.0 }
 0x135   : > { %v726_v35 = vand.u32 2147483647, %v724_v39  ;;  %vm764_vm3 = vcmp.ge.f32.partialorder %v724_v39, 0.0 }
 0x136   : > { %v729_v54 = vmul.f32 0.3275911, %v727_v34  ;;  %v753_v43 = vsub.f32 0.0, %v727_v34 }
 0x137   : > { %v728_v9 = vmul.f32 0.3275911, %v726_v35  ;;  %v752_v44 = vsub.f32 0.0, %v726_v35 }
 0x138   : > { %v731_v41 = vadd.f32 1.0, %v729_v54  ;;  %v755_v45 = vmul.f32 %v753_v43, %v727_v34  ;;  %v723_v54 = vmul.f32 0.5, %v721_v24  ;;  %v722_v43 = vmul.f32 0.5, %v720_v25  ;;  %v1556_v25 = vld [vmem:[%s2163_s5 + $0x18] sm:$0xff]  }
 0x139   : > { %v730_v42 = vadd.f32 1.0, %v728_v9  ;;  %v754_v46 = vmul.f32 %v752_v44, %v726_v35  ;;  %1490 = vmatpush3.bf16.msra.mxu0 %v1556_v25 }
 0x13a   : > { %1568 = vrcp.f32 %v731_v41  ;;  %v758_v17 = vmul.f32 1.442695, %v755_v45  ;;  %1491 = vmatprep.subr.bf16.mxu0 %v1666_v0 }
 0x13b   : > { %1570 = vrcp.f32 %v730_v42  ;;  %v756_v50 = vmul.f32 1.442695, %v754_v46  ;;  %v777_v42 = vrot.slane %v1971_v52, %v1814_v58  ;;  %v783_v46 = vrot.slane %v1971_v52, %v1817_v60 }
 0x13c   : > { %1572 = vpow2.f32 %v758_v17 }
 0x13d   : > { %1574 = vpow2.f32 %v756_v50  ;;  %v1557_v50 = vld [vmem:[%s2163_s5 + $0x10] sm:$0xff]  }
 0x13e   : > { %1492 = vmatpush3.bf16.msra.mxu0 %v1557_v50 }
 0x13f   : > { %1503 = vmatprep.subr.bf16.mxu0 %v1666_v0 }
 0x147   : > { %v1569_v47 = vpop.eup %1568 }
 0x148   : > { %v1571_v53 = vpop.eup %1570  ;;  %v735_v48 = vmul.f32 1.0614054, %v1569_v47 }
 0x149   : > { %v734_v49 = vmul.f32 1.0614054, %v1571_v53  ;;  %v1573_v7 = vpop.eup %1572 }
 0x14a   : > { %v737_v55 = vadd.f32 -1.4531521, %v735_v48  ;;  %v1575_v13 = vpop.eup %1574 }
 0x14b   : > { %v736_v51 = vadd.f32 -1.4531521, %v734_v49 }
 0x14c   : > { %v739_v56 = vmul.f32 %v1569_v47, %v737_v55 }
 0x14d   : > { %v738_v57 = vmul.f32 %v1571_v53, %v736_v51 }
 0x14e   : > { %v741_v36 = vadd.f32 1.4214138, %v739_v56 }
 0x14f   : > { %v740_v59 = vadd.f32 1.4214138, %v738_v57 }
 0x150   : > { %v743_v61 = vmul.f32 %v1569_v47, %v741_v36 }
 0x151   : > { %v742_v62 = vmul.f32 %v1571_v53, %v740_v59 }
 0x152   : > { %v745_v2 = vadd.f32 -0.28449672, %v743_v61 }
 0x153   : > { %v744_v1 = vadd.f32 -0.28449672, %v742_v62 }
 0x154   : > { %v747_v38 = vmul.f32 %v1569_v47, %v745_v2 }
 0x155   : > { %v746_v3 = vmul.f32 %v1571_v53, %v744_v1 }
 0x156   : > { %v749_v4 = vadd.f32 0.2548296, %v747_v38 }
 0x157   : > { %v748_v5 = vadd.f32 0.2548296, %v746_v3 }
 0x158   : > { %v751_v6 = vmul.f32 %v1569_v47, %v749_v4 }
 0x159   : > { %v750_v8 = vmul.f32 %v1571_v53, %v748_v5 }
 0x15a   : > { %v761_v14 = vmul.f32 %v1573_v7, %v751_v6 }
 0x15b   : > { %v760_v16 = vmul.f32 %v1575_v13, %v750_v8 }
 0x15c   : > { %v763_v15 = vsub.f32 1.0, %v761_v14 }
 0x15d   : > { %v762_v18 = vsub.f32 1.0, %v760_v16 }
 0x15e   : > { %v767_v22 = vsub.f32 0.0, %v763_v15 }
 0x15f   : > { %v766_v34 = vsub.f32 0.0, %v762_v18 }
 0x160   : > { %v769_v35 = vsel %vm765_vm4, %v763_v15, %v767_v22 }
 0x161   : > { %v768_v9 = vsel %vm764_vm3, %v762_v18, %v766_v34  ;;  %v771_v41 = vadd.f32 1.0, %v769_v35  ;;  %vm809_vm3 = vcmask 261120  }
 0x162   : > { %v770_v44 = vadd.f32 1.0, %v768_v9 }
 0x163   : > { %v773_v45 = vmul.f32 %v771_v41, %v723_v54 }
 0x164   : > { %v772_v47 = vmul.f32 %v770_v44, %v722_v43 }
 0x165   : > { %v779_v53 = vmul.f32 %v777_v42, %v773_v45 }
 0x166   : > { %v778_v48 = vmul.f32 %v777_v42, %v772_v47 }
 0x167   : > { %v785_v17 = vadd.f32 %v783_v46, %v779_v53 }
 0x168   : > { %v784_v30 = vadd.f32 %v783_v46, %v778_v48 }
 0x169   : > { %v787_v39 = vadd.f32 %v785_v17, %v1884_v37 }
 0x16a   : > { %v786_v24 = vadd.f32 %v784_v30, %v1868_v33  ;;  %v796_v33 = vrot.slane %v1971_v52, %v1860_v29 }
 0x16c   : > { %v788_v49 = vpack.c.bf16 %v787_v39, %v786_v24 }
 0x16e   : > { %1486 = vmatmul.mubr.msk.bf16.vlgmr.msra.gmra.mxu1 %vm809_vm3, %v788_v49 }
 0x16f   : > { %1499 = vmatprep.mubr.msk.bf16.mxu1 %vm2170_vm1, %v1666_v0 }
 0x22e   : > { %v847_v37 = vpop.f32.mrf.mxu1 }
 0x22f   : > { %v848_v55 = vadd.f32 %v847_v37, %v796_v33 }
 0x230   : > { %v1487_v51 = vpop.f32.mrf.mxu1 }
 0x231   : > { %v856_v56 = vmul.f32 0.70710677, %v848_v55 }
 0x232   : > { %v850_v57 = vpop.f32.mrf.mxu1 }
 0x233   : > { %v858_v36 = vand.u32 2147483647, %v856_v56  ;;  %v851_v59 = vadd.f32 %v850_v57, %v796_v33  ;;  %vm896_vm4 = vcmp.ge.f32.partialorder %v856_v56, 0.0 }
 0x234   : > { %v1488_v61 = vpop.f32.mrf.mxu1 }
 0x235   : > { %v860_v62 = vmul.f32 0.3275911, %v858_v36  ;;  %v857_v2 = vmul.f32 0.70710677, %v851_v59  ;;  %v884_v5 = vsub.f32 0.0, %v858_v36  ;;  %v855_v56 = vmul.f32 0.5, %v851_v59 }
 0x237   : > { %v862_v1 = vadd.f32 1.0, %v860_v62  ;;  %v859_v38 = vand.u32 2147483647, %v857_v2  ;;  %v886_v6 = vmul.f32 %v884_v5, %v858_v36  ;;  %v854_v36 = vmul.f32 0.5, %v848_v55  ;;  %v1441_v5 = vld [vmem:[%s2161_s3 + $0x10] sm:$0xff] }
 0x238   : > { %v909_v62 = vrot.slane %v1971_v52, %v1821_v63  ;;  %vm897_vm1 = vcmp.ge.f32.partialorder %v857_v2, 0.0  ;;  %v952_v2 = vrot.slane %v1441_v5, %v1814_v58  ;;  %v980_v59 = vrot.slane %v1441_v5, %v1860_v29 }
 0x239   : > { %1576 = vrcp.f32 %v862_v1  ;;  %v861_v3 = vmul.f32 0.3275911, %v859_v38  ;;  %v885_v7 = vsub.f32 0.0, %v859_v38  ;;  %v888_v14 = vmul.f32 1.442695, %v886_v6 }
 0x23a   : > { %v1022_v26 = vrot.slane %v1441_v5, %v696_v40 }
 0x23b   : > { %v863_v4 = vadd.f32 1.0, %v861_v3  ;;  %v887_v16 = vmul.f32 %v885_v7, %v859_v38  ;;  %v915_v3 = vrot.slane %v1971_v52, %v1865_v32  ;;  %v966_v52 = vrot.slane %v1441_v5, %v1817_v60 }
 0x23d   : > { %1578 = vrcp.f32 %v863_v4  ;;  %v890_v35 = vmul.f32 1.442695, %v887_v16  ;;  %v938_v16 = vrot.slane %v1441_v5, %v1798_v11 }
 0x23e   : > { %1580 = vpow2.f32 %v888_v14 }
 0x23f   : > { %1582 = vpow2.f32 %v890_v35 }
 0x246   : > { %v1577_v8 = vpop.eup %1576 }
 0x247   : > { %v866_v13 = vmul.f32 1.0614054, %v1577_v8 }
 0x249   : > { %v868_v15 = vadd.f32 -1.4531521, %v866_v13  ;;  %v926_v13 = vrot.slane %v1441_v5, %v1821_v63 }
 0x24a   : > { %v1579_v18 = vpop.eup %1578 }
 0x24b   : > { %v870_v22 = vmul.f32 %v1577_v8, %v868_v15  ;;  %v867_v34 = vmul.f32 1.0614054, %v1579_v18  ;;  %v1581_v30 = vpop.eup %1580  ;;  %v2012_v15 = vrot.slane %v1441_v5, %v677_v20 }
 0x24c   : > { %v1583_v50 = vpop.eup %1582 }
 0x24d   : > { %v872_v54 = vadd.f32 1.4214138, %v870_v22  ;;  %v869_v9 = vadd.f32 -1.4531521, %v867_v34  ;;  %v994_v22 = vrot.slane %v1441_v5, %v1865_v32  ;;  %v1444_v5 = vld [vmem:[%s2161_s3 + $0x18] ss:$0 sm:$0xff] }
 0x24f   : > { %v874_v41 = vmul.f32 %v1577_v8, %v872_v54  ;;  %v871_v42 = vmul.f32 %v1579_v18, %v869_v9 }
 0x251   : > { %v876_v43 = vadd.f32 -0.28449672, %v874_v41  ;;  %v873_v44 = vadd.f32 1.4214138, %v871_v42 }
 0x253   : > { %v878_v45 = vmul.f32 %v1577_v8, %v876_v43  ;;  %v875_v46 = vmul.f32 %v1579_v18, %v873_v44 }
 0x255   : > { %v880_v47 = vadd.f32 0.2548296, %v878_v45  ;;  %v877_v53 = vadd.f32 -0.28449672, %v875_v46 }
 0x257   : > { %v882_v48 = vmul.f32 %v1577_v8, %v880_v47  ;;  %v879_v17 = vmul.f32 %v1579_v18, %v877_v53 }
 0x259   : > { %v892_v39 = vmul.f32 %v1581_v30, %v882_v48  ;;  %v881_v24 = vadd.f32 0.2548296, %v879_v17 }
 0x25b   : > { %v894_v49 = vsub.f32 1.0, %v892_v39  ;;  %v883_v25 = vmul.f32 %v1579_v18, %v881_v24 }
 0x25d   : > { %v898_v33 = vsub.f32 0.0, %v894_v49  ;;  %v893_v37 = vmul.f32 %v1583_v50, %v883_v25 }
 0x25f   : > { %v900_v51 = vsel %vm896_vm4, %v894_v49, %v898_v33  ;;  %v895_v57 = vsub.f32 1.0, %v893_v37 }
 0x260   : > { %v902_v61 = vadd.f32 1.0, %v900_v51 }
 0x261   : > { %v899_v1 = vsub.f32 0.0, %v895_v57 }
 0x262   : > { %v904_v38 = vmul.f32 %v902_v61, %v854_v36 }
 0x263   : > { %v901_v4 = vsel %vm897_vm1, %v895_v57, %v899_v1  ;;  %vm2173_vm1 = vcmp.lt.s32.totalorder %v1857_v23, 16 }
 0x264   : > { %v910_v6 = vmul.f32 %v909_v62, %v904_v38  ;;  %v903_v7 = vadd.f32 1.0, %v901_v4 }
 0x266   : > { %v905_v8 = vmul.f32 %v903_v7, %v855_v56  ;;  %v2004_v55 = vadd.f32 %v915_v3, %v910_v6 }
 0x268   : > { %v911_v14 = vmul.f32 %v909_v62, %v905_v8  ;;  %v927_v34 = vmul.f32 %v926_v13, %v2004_v55  ;;  %v929_v35 = vrot.slane %v2004_v55, 4  ;;  %v943_v54 = vrot.slane %v2004_v55, 5 }
 0x269   : > { %v957_v9 = vrot.slane %v2004_v55, 6  ;;  %v971_v43 = vrot.slane %v2004_v55, 7  ;;  %v985_v46 = vrot.slane %v2004_v55, 1  ;;  %v999_v47 = vrot.slane %v2004_v55, 2 }
 0x26a   : > { %v2014_v18 = vadd.f32 %v915_v3, %v911_v14 }
 0x26c   : > { %v930_v41 = vrot.slane %v2014_v18, 4  ;;  %v944_v42 = vrot.slane %v2014_v18, 5  ;;  %v958_v20 = vrot.slane %v2014_v18, 6  ;;  %v928_v44 = vmul.f32 %v926_v13, %v2014_v18 }
 0x26d   : > { %v972_v45 = vrot.slane %v2014_v18, 7  ;;  %v986_v25 = vrot.slane %v2014_v18, 1  ;;  %v1000_v51 = vrot.slane %v2014_v18, 2  ;;  %v1014_v61 = vrot.slane %v2014_v18, 3 }
 0x26e   : > { %v931_v53 = vsel %vm571_vm9, %v929_v35, %v930_v41  ;;  %v932_v48 = vsel %vm571_vm9, %v930_v41, %v929_v35  ;;  %v945_v17 = vsel %vm590_vm10, %v943_v54, %v944_v42  ;;  %v946_v30 = vsel %vm590_vm10, %v944_v42, %v943_v54 }
 0x26f   : > { %v933_v39 = vsel %vm498_vm5, %v932_v48, 0.0  ;;  %v940_v24 = vmul.f32 %v938_v16, %v931_v53  ;;  %v947_v49 = vsel %vm506_vm6, %v946_v30, 0.0  ;;  %v959_v33 = vsel %vm609_vm12, %v957_v9, %v958_v20 }
 0x270   : > { %v939_v50 = vmul.f32 %v938_v16, %v933_v39  ;;  %v960_v37 = vsel %vm609_vm12, %v958_v20, %v957_v9  ;;  %v954_v36 = vmul.f32 %v952_v2, %v945_v17  ;;  %v953_v62 = vmul.f32 %v952_v2, %v947_v49 }
 0x271   : > { %v942_v57 = vadd.f32 %v940_v24, %v928_v44  ;;  %v961_v19 = vsel %vm514_vm7, %v960_v37, 0.0  ;;  %v973_v1 = vsel %vm628_vm13, %v971_v43, %v972_v45  ;;  %v974_v38 = vsel %vm628_vm13, %v972_v45, %v971_v43 }
 0x272   : > { %v941_v12 = vadd.f32 %v939_v50, %v927_v34  ;;  %v968_v4 = vmul.f32 %v966_v52, %v959_v33  ;;  %v975_v6 = vsel %vm522_vm8, %v974_v38, 0.0  ;;  %v988_v56 = vsel %vm647_vm14, %v986_v25, %v985_v46 }
 0x273   : > { %v956_v3 = vadd.f32 %v954_v36, %v942_v57  ;;  %v967_v7 = vmul.f32 %v966_v52, %v961_v19  ;;  %v990_v8 = vsel %vm533_vm11, %v988_v56, 0.0  ;;  %v1013_v13 = vrot.slane %v2004_v55, 3 }
 0x274   : > { %v955_v21 = vadd.f32 %v953_v62, %v941_v12  ;;  %v982_v16 = vmul.f32 %v980_v59, %v973_v1  ;;  %v987_v2 = vsel %vm647_vm14, %v985_v46, %v986_v25  ;;  %v1002_v34 = vsel %vm666_vm15, %v1000_v51, %v999_v47 }
 0x275   : > { %v970_v14 = vadd.f32 %v968_v4, %v956_v3  ;;  %v981_v54 = vmul.f32 %v980_v59, %v975_v6  ;;  %v1004_v52 = vsel %vm541_vm0, %v1002_v34, 0.0  ;;  %v996_v9 = vmul.f32 %v994_v22, %v990_v8  ;;  %v2085_v59 = vld [vmem:[%s2162_s4 + $0x8] sm:$0x3f] }
 0x276   : > { %v969_v35 = vadd.f32 %v967_v7, %v955_v21  ;;  %v1001_v41 = vsel %vm666_vm15, %v999_v47, %v1000_v51  ;;  %v1016_v42 = vsel %vm685_vm2, %v1014_v61, %v1013_v13  ;;  %v995_v43 = vmul.f32 %v994_v22, %v987_v2 }
 0x277   : > { %v984_v27 = vadd.f32 %v982_v16, %v970_v14  ;;  %v1018_v44 = vsel %vm2173_vm1, %v1016_v42, 0.0  ;;  %v1010_v40 = vmul.f32 %v2012_v15, %v1004_v52  ;;  %v1015_v28 = vsel %vm685_vm2, %v1013_v13, %v1014_v61 }
 0x278   : > { %v983_v20 = vadd.f32 %v981_v54, %v969_v35  ;;  %v1009_v22 = vmul.f32 %v2012_v15, %v1001_v41  ;;  %vm2174_vm5 = vcmp.lt.s32.totalorder %v1862_v31, 16  ;;  %v1024_v17 = vmul.f32 %v1022_v26, %v1018_v44 }
 0x279   : > { %v998_v45 = vadd.f32 %v996_v9, %v984_v27  ;;  %v1028_v23 = vsel %vm2174_vm5, %v932_v48, 0.0  ;;  %v1023_v10 = vmul.f32 %v1022_v26, %v1015_v28  ;;  %v1040_v49 = vrot.slane %v2085_v59, %v1798_v11 }
 0x27a   : > { %v997_v46 = vadd.f32 %v995_v43, %v983_v20  ;;  %v1034_v24 = vmul.f32 %v1444_v5, %v1028_v23  ;;  %v1033_v50 = vmul.f32 %v1444_v5, %v931_v53  ;;  %vm2175_vm8 = vmmov 0  }
 0x27b   : > { %v1012_v47 = vadd.f32 %v1010_v40, %v998_v45  ;;  %vm1241_vm11 = vcmask 130048   ;;  %vm1346_vm12 = vcmask 8192  }
 0x27c   : > { %v1011_v30 = vadd.f32 %v1009_v22, %v997_v46 }
 0x27d   : > { %v1026_v39 = vadd.f32 %v1024_v17, %v1012_v47 }
 0x27e   : > { %v1025_v25 = vadd.f32 %v1023_v10, %v1011_v30 }
 0x27f   : > { %v1036_v33 = vadd.f32 %v1034_v24, %v1026_v39  ;;  %v1098_v39 = vrot.slane %v2085_v59, %v1814_v58  ;;  %v1558_v58 = vld [vmem:[%s2165_s7 + $0x8] sm:$0xff]  }
 0x280   : > { %v1035_v37 = vadd.f32 %v1033_v50, %v1025_v25  ;;  %v1104_v50 = vrot.slane %v2085_v59, %v1817_v60  ;;  %v1118_v60 = vrot.slane %v2085_v59, %v1860_v29 }
 0x281   : > { %v1042_v51 = vadd.f32 %v1040_v49, %v1036_v33 }
 0x282   : > { %v1041_v57 = vadd.f32 %v1040_v49, %v1035_v37 }
 0x283   : > { %v1046_v36 = vmul.f32 0.70710677, %v1042_v51  ;;  %v1044_v17 = vmul.f32 0.5, %v1042_v51 }
 0x284   : > { %v1045_v15 = vmul.f32 0.70710677, %v1041_v57  ;;  %v1043_v24 = vmul.f32 0.5, %v1041_v57 }
 0x285   : > { %v1048_v19 = vand.u32 2147483647, %v1046_v36  ;;  %vm1086_vm6 = vcmp.ge.f32.partialorder %v1046_v36, 0.0 }
 0x286   : > { %v1047_v31 = vand.u32 2147483647, %v1045_v15  ;;  %vm1085_vm7 = vcmp.ge.f32.partialorder %v1045_v15, 0.0 }
 0x287   : > { %v1050_v48 = vmul.f32 0.3275911, %v1048_v19  ;;  %v1074_v1 = vsub.f32 0.0, %v1048_v19 }
 0x288   : > { %v1049_v61 = vmul.f32 0.3275911, %v1047_v31  ;;  %v1073_v38 = vsub.f32 0.0, %v1047_v31 }
 0x289   : > { %v1052_v12 = vadd.f32 1.0, %v1050_v48  ;;  %v1076_v3 = vmul.f32 %v1074_v1, %v1048_v19 }
 0x28a   : > { %v1051_v62 = vadd.f32 1.0, %v1049_v61  ;;  %v1075_v11 = vmul.f32 %v1073_v38, %v1047_v31 }
 0x28b   : > { %1584 = vrcp.f32 %v1052_v12  ;;  %v1079_v56 = vmul.f32 1.442695, %v1076_v3 }
 0x28c   : > { %1586 = vrcp.f32 %v1051_v62  ;;  %v1077_v7 = vmul.f32 1.442695, %v1075_v11 }
 0x28d   : > { %1588 = vpow2.f32 %v1079_v56 }
 0x28e   : > { %1590 = vpow2.f32 %v1077_v7 }
 0x298   : > { %v1585_v4 = vpop.eup %1584 }
 0x299   : > { %v1587_v53 = vpop.eup %1586  ;;  %v1056_v6 = vmul.f32 1.0614054, %v1585_v4 }
 0x29a   : > { %v1055_v21 = vmul.f32 1.0614054, %v1587_v53  ;;  %v1589_v43 = vpop.eup %1588 }
 0x29b   : > { %v1058_v8 = vadd.f32 -1.4531521, %v1056_v6  ;;  %v1591_v45 = vpop.eup %1590 }
 0x29c   : > { %v1057_v13 = vadd.f32 -1.4531521, %v1055_v21 }
 0x29d   : > { %v1060_v14 = vmul.f32 %v1585_v4, %v1058_v8 }
 0x29e   : > { %v1059_v16 = vmul.f32 %v1587_v53, %v1057_v13 }
 0x29f   : > { %v1062_v2 = vadd.f32 1.4214138, %v1060_v14 }
 0x2a0   : > { %v1061_v34 = vadd.f32 1.4214138, %v1059_v16 }
 0x2a1   : > { %v1064_v26 = vmul.f32 %v1585_v4, %v1062_v2 }
 0x2a2   : > { %v1063_v35 = vmul.f32 %v1587_v53, %v1061_v34 }
 0x2a3   : > { %v1066_v54 = vadd.f32 -0.28449672, %v1064_v26 }
 0x2a4   : > { %v1065_v52 = vadd.f32 -0.28449672, %v1063_v35 }
 0x2a5   : > { %v1068_v27 = vmul.f32 %v1585_v4, %v1066_v54 }
 0x2a6   : > { %v1067_v9 = vmul.f32 %v1587_v53, %v1065_v52 }
 0x2a7   : > { %v1070_v41 = vadd.f32 0.2548296, %v1068_v27 }
 0x2a8   : > { %v1069_v42 = vadd.f32 0.2548296, %v1067_v9 }
 0x2a9   : > { %v1072_v20 = vmul.f32 %v1585_v4, %v1070_v41 }
 0x2aa   : > { %v1071_v44 = vmul.f32 %v1587_v53, %v1069_v42 }
 0x2ab   : > { %v1082_v40 = vmul.f32 %v1589_v43, %v1072_v20 }
 0x2ac   : > { %v1081_v28 = vmul.f32 %v1591_v45, %v1071_v44 }
 0x2ad   : > { %v1084_v5 = vsub.f32 1.0, %v1082_v40 }
 0x2ae   : > { %v1083_v46 = vsub.f32 1.0, %v1081_v28 }
 0x2af   : > { %v1088_v22 = vsub.f32 0.0, %v1084_v5 }
 0x2b0   : > { %v1087_v23 = vsub.f32 0.0, %v1083_v46 }
 0x2b1   : > { %v1090_v47 = vsel %vm1086_vm6, %v1084_v5, %v1088_v22 }
 0x2b2   : > { %v1089_v30 = vsel %vm1085_vm7, %v1083_v46, %v1087_v23  ;;  %v1092_v10 = vadd.f32 1.0, %v1090_v47 }
 0x2b3   : > { %v1091_v49 = vadd.f32 1.0, %v1089_v30 }
 0x2b4   : > { %v1094_v25 = vmul.f32 %v1092_v10, %v1044_v17 }
 0x2b5   : > { %v1093_v33 = vmul.f32 %v1091_v49, %v1043_v24 }
 0x2b6   : > { %v1100_v37 = vmul.f32 %v1098_v39, %v1094_v25 }
 0x2b7   : > { %v1099_v19 = vmul.f32 %v1098_v39, %v1093_v33 }
 0x2b8   : > { %v1106_v31 = vadd.f32 %v1104_v50, %v1100_v37  ;;  %v1230_v37 = vrot.slane %v2085_v59, %v1821_v63  ;;  %v1559_v63 = vld [vmem:[%s2165_s7] sm:$0xff]  }
 0x2b9   : > { %v1105_v36 = vadd.f32 %v1104_v50, %v1099_v19 }
 0x2ba   : > { %v1108_v15 = vadd.f32 %v1106_v31, %v2014_v18 }
 0x2bb   : > { %v1107_v51 = vadd.f32 %v1105_v36, %v2004_v55 }
 0x2bd   : > { %v1109_v48 = vpack.c.bf16 %v1108_v15, %v1107_v51  ;;  %v1236_v51 = vrot.slane %v2085_v59, %v1865_v32 }
 0x2bf   : > { %1494 = vmatmul.mubr.msk.bf16.vlgmr.msra.gmra.mxu0 %vm809_vm3, %v1109_v48 }
 0x2c0   : > { %1507 = vmatprep.mubr.msk.bf16.mxu0 %vm2175_vm8, %v1666_v0  ;;  %1504 = vmatpush3.bf16.msra.mxu0 %v1558_v58 }
 0x2c1   : > { %1505 = vmatprep.subr.bf16.mxu0 %v1666_v0 }
 0x2c4   : > { %1506 = vmatpush3.bf16.msra.mxu0 %v1559_v63 }
 0x37f   : > { %v1168_v57 = vpop.f32.mrf.mxu0 }
 0x380   : > { %v1169_v18 = vadd.f32 %v1168_v57, %v1118_v60 }
 0x381   : > { %v1495_v61 = vpop.f32.mrf.mxu0 }
 0x382   : > { %v1177_v55 = vmul.f32 0.70710677, %v1169_v18  ;;  %v1175_v49 = vmul.f32 0.5, %v1169_v18  ;;  %v1239_v18 = vld [vmem:[%s2164_s6] sm:$0x1] }
 0x383   : > { %v1171_v12 = vpop.f32.mrf.mxu0 }
 0x384   : > { %v1179_v62 = vand.u32 2147483647, %v1177_v55  ;;  %v1172_v1 = vadd.f32 %v1171_v12, %v1118_v60  ;;  %vm1217_vm9 = vcmp.ge.f32.partialorder %v1177_v55, 0.0 }
 0x385   : > { %v1496_v38 = vpop.f32.mrf.mxu0 }
 0x386   : > { %v1181_v3 = vmul.f32 0.3275911, %v1179_v62  ;;  %v1178_v11 = vmul.f32 0.70710677, %v1172_v1  ;;  %v1205_v0 = vsub.f32 0.0, %v1179_v62  ;;  %v1176_v31 = vmul.f32 0.5, %v1172_v1 }
 0x387   : > { %v1290_v1 = vld [vmem:[%s2166_s8] sm:$0x1] }
 0x388   : > { %v1183_v4 = vadd.f32 1.0, %v1181_v3  ;;  %v1180_v53 = vand.u32 2147483647, %v1178_v11  ;;  %v1207_v21 = vmul.f32 %v1205_v0, %v1179_v62  ;;  %vm1218_vm10 = vcmp.ge.f32.partialorder %v1178_v11, 0.0 }
 0x38a   : > { %1592 = vrcp.f32 %v1183_v4  ;;  %v1182_v6 = vmul.f32 0.3275911, %v1180_v53  ;;  %v1206_v7 = vsub.f32 0.0, %v1180_v53  ;;  %v1209_v13 = vmul.f32 1.442695, %v1207_v21 }
 0x38c   : > { %v1184_v56 = vadd.f32 1.0, %v1182_v6  ;;  %v1208_v14 = vmul.f32 %v1206_v7, %v1180_v53 }
 0x38e   : > { %1594 = vrcp.f32 %v1184_v56  ;;  %v1211_v35 = vmul.f32 1.442695, %v1208_v14 }
 0x38f   : > { %1596 = vpow2.f32 %v1209_v13 }
 0x390   : > { %1598 = vpow2.f32 %v1211_v35 }
 0x397   : > { %v1593_v29 = vpop.eup %1592 }
 0x398   : > { %v1187_v8 = vmul.f32 1.0614054, %v1593_v29 }
 0x39a   : > { %v1189_v16 = vadd.f32 -1.4531521, %v1187_v8 }
 0x39b   : > { %v1595_v2 = vpop.eup %1594 }
 0x39c   : > { %v1191_v34 = vmul.f32 %v1593_v29, %v1189_v16  ;;  %v1188_v26 = vmul.f32 1.0614054, %v1595_v2  ;;  %v1597_v5 = vpop.eup %1596 }
 0x39d   : > { %v1599_v17 = vpop.eup %1598 }
 0x39e   : > { %v1193_v54 = vadd.f32 1.4214138, %v1191_v34  ;;  %v1190_v52 = vadd.f32 -1.4531521, %v1188_v26 }
 0x3a0   : > { %v1195_v27 = vmul.f32 %v1593_v29, %v1193_v54  ;;  %v1192_v9 = vmul.f32 %v1595_v2, %v1190_v52 }
 0x3a2   : > { %v1197_v41 = vadd.f32 -0.28449672, %v1195_v27  ;;  %v1194_v42 = vadd.f32 1.4214138, %v1192_v9 }
 0x3a4   : > { %v1199_v20 = vmul.f32 %v1593_v29, %v1197_v41  ;;  %v1196_v43 = vmul.f32 %v1595_v2, %v1194_v42 }
 0x3a6   : > { %v1201_v44 = vadd.f32 0.2548296, %v1199_v20  ;;  %v1198_v45 = vadd.f32 -0.28449672, %v1196_v43 }
 0x3a8   : > { %v1203_v40 = vmul.f32 %v1593_v29, %v1201_v44  ;;  %v1200_v28 = vmul.f32 %v1595_v2, %v1198_v45 }
 0x3aa   : > { %v1213_v46 = vmul.f32 %v1597_v5, %v1203_v40  ;;  %v1202_v22 = vadd.f32 0.2548296, %v1200_v28 }
 0x3ac   : > { %v1215_v23 = vsub.f32 1.0, %v1213_v46  ;;  %v1204_v47 = vmul.f32 %v1595_v2, %v1202_v22 }
 0x3ae   : > { %v1219_v30 = vsub.f32 0.0, %v1215_v23  ;;  %v1214_v10 = vmul.f32 %v1599_v17, %v1204_v47 }
 0x3b0   : > { %v1221_v39 = vsel %vm1217_vm9, %v1215_v23, %v1219_v30  ;;  %v1216_v24 = vsub.f32 1.0, %v1214_v10 }
 0x3b1   : > { %v1223_v25 = vadd.f32 1.0, %v1221_v39 }
 0x3b2   : > { %v1220_v50 = vsub.f32 0.0, %v1216_v24 }
 0x3b3   : > { %v1225_v33 = vmul.f32 %v1223_v25, %v1175_v49 }
 0x3b4   : > { %v1222_v19 = vsel %vm1218_vm10, %v1216_v24, %v1220_v50 }
 0x3b5   : > { %v1224_v36 = vadd.f32 1.0, %v1222_v19  ;;  %v1231_v15 = vmul.f32 %v1230_v37, %v1225_v33 }
 0x3b7   : > { %v1226_v48 = vmul.f32 %v1224_v36, %v1176_v31  ;;  %v1237_v60 = vadd.f32 %v1236_v51, %v1231_v15 }
 0x3b9   : > { %v1232_v58 = vmul.f32 %v1230_v37, %v1226_v48 }
 0x3bb   : > { %v1238_v57 = vadd.f32 %v1236_v51, %v1232_v58 }
 0x3bd   : > { %v1240_v61 = vpack.c.bf16 %v1238_v57, %v1237_v60 }
 0x3bf   : > { %1498 = vmatpush3.bf16.msra.mxu1 %v1240_v61 }
 0x3c2   : > { %1500 = vmatmul.mubr.msk.bf16.vlgmr.msra.gmra.mxu1 %vm1241_vm11, %v1239_v18 }
 0x482   : > { %v1279_v55 = vpop.f32.mrf.mxu1 }
 0x483   : > { %v1285_v12 = vpack.c.bf16 %v1279_v55, %v1279_v55 }
 0x484   : > { %v1501_v32 = vpop.f32.mrf.mxu1 }
 0x485   : > { %1508 = vmatmul.mubr.msk.bf16.vlgmr.msra.gmra.mxu0 %vm809_vm3, %v1285_v12 }
 0x486   : > { %v1282_v59 = vpop.f32.mrf.mxu1 }
 0x488   : > { %v1502_v62 = vpop.f32.mrf.mxu1 }
 0x545   : > { %v1340_v38 = vpop.f32.mrf.mxu0 }
 0x546   : > { %v1341_v3 = vadd.f32 %v1340_v38, %v1290_v1 }
 0x547   : > { %v1509_v11 = vpop.f32.mrf.mxu0 }
 0x548   : > { %v1347_v4 = vsel %vm1346_vm12, %v1341_v3, -inf }
 0x549   : > { %1348 = vmax.xlane.f32.xlu0 %v1347_v4  ;;  %v1343_v53 = vpop.f32.mrf.mxu0 }
 0x54b   : > { %v1510_v6 = vpop.f32.mrf.mxu0 }
 0x5d2   : > { %v1349_v56 = vpop.xlane.xlu0 %1348 }
 0x5d3   : > { %v1350_v0 = vsub.f32 %v1341_v3, %v1349_v56 }
 0x5d5   : > { %v1351_v21 = vmul.f32 1.442695, %v1350_v0 }
 0x5d7   : > { %1600 = vpow2.f32 %v1351_v21 }
 0x5e4   : > { %v1601_v7 = vpop.eup %1600 }
 0x5e5   : > { %v1353_v29 = vsel %vm1346_vm12, %v1601_v7, 0.0 }
 0x5e6   : > { %1354 = vadd.xlane.f32.xlu0 %v1353_v29 }
 0x66f   : > { %v1355_v8 = vpop.xlane.xlu0 %1354 }
 0x670   : > { %1602 = vlog2.f32 %v1355_v8 }
 0x67d   : > { %v1603_v13 = vpop.eup %1602 }
 0x67e   : > { %v1357_v14 = vmul.f32 0.6931472, %v1603_v13 }
 0x680   : > { %v1358_v16 = vsub.f32 %v1350_v0, %v1357_v14 }
 0x682   : > { %1359 = vst.msk [vmem:[%s325_s26] sm:$0x1] %vm1346_vm12, %v1358_v16 }
 0x683   : > { %1617 = shalt.err (!%p1614_p3)
}
 0x684   : > { %s1618_s23 = scalar_lea.hbm %s1371_s14, 16  ;;  %s1622_s26 = scalar_lea.hbm %s2167_s9, 32 }
 0x685   : > { %p1619_p4 = scmp.ne.s32.totalorder %s1371_s14, %s1618_s23  ;;  %p1623_p9 = scmp.lt.s32.totalorder %s1371_s14, %s2167_s9 }
 0x686   : > { %p1624_p10 = scmp.lt.s32.totalorder %s1622_s26, %s1618_s23 }
 0x687   : > { %p1620_p7 = pnand %p1619_p4, %p1757_p5 }
 0x688   : > { %p1625_p11 = por %p1624_p10, %p1623_p9 }
 0x689   : > { %p1621_p8 = pneg %p1620_p7 }
 0x68b   : > { %p1626_p12 = pnand %p1625_p11, %p1621_p8 }
 0x68d   : > { %1629 = shalt.err (!%p1626_p12)
}
 0x68e   : > { %1511 = dma.vmem_to_hbm [thread:$0]  (%p1757_p5), %s1374_s27, 16, %s1371_s14, %s1361_s16  }
 0x68f PF: > { %p1517_p13 = scmp.ge.s32.totalorder %s1664_s12, 2  ;;  %s1385_s17 = sand.u32 1, %s1652_s30  }
 0x690   : > { %s1386_s21 = scalar_lea.sflag [#allocation3], %s1385_s17 }
 0x691   : > { %p1514_p0 = pnand %p1517_p13, %p1761_p6 }
 0x693   : > { %p1515_p1 = pneg %p1514_p0 }
 0x695   : > { %1647 = dma.done.wait (%p1515_p1), %s1386_s21, 16  }
 0x696   : > { %1649 = vsyncadd (%p1515_p1), %s1386_s21, 4294967280  ;;  %p19_p2 = scmp.ge.s32.totalorder %s1744_s15, 4   ;;  %s2176_s30 = smov %s1656_s10 }
 0x697   : > { %s2177_s10 = smov %s1660_s11  ;;  %s2178_s11 = smov %s1755_s18 }
 0x698   : > { %s2179_s12 = smov %s1744_s15  ;;  %21 = sbr.rel (!%p19_p2) target bundleno = 3 (0x3), region = 94 }
 0x69d   :  { %1390 = vsyncpa [#allocation3], 1 }
 0x69e   :  { %1392 = vsyncpa [#allocation3 + $0x1], 1 }

</bundles_post_ra>
